<compile_context>
chip_gen: v6e
topology: v6e:2x2x1
jax: 0.10.0
libtpu: 0.0.40
codegen_flags: <defaults>
</compile_context>

<pallas_src>
import functools
import math

import jax
import jax.numpy as jnp
from jax.experimental import pallas as pl
from jax.experimental.pallas import tpu as pltpu


# ---------------------------------------------------------------------------
# In-kernel helpers
# ---------------------------------------------------------------------------
def _layernorm(x, g, b, eps=1e-5):
    # torch.nn.LayerNorm: biased variance, eps inside the sqrt
    mu = jnp.mean(x, axis=-1, keepdims=True)
    var = jnp.mean((x - mu) ** 2, axis=-1, keepdims=True)
    return (x - mu) * jax.lax.rsqrt(var + eps) * g + b


def _gelu(x):
    # exact (erf-based) gelu, matching the reference `gelu` function
    return x * 0.5 * (1.0 + jax.scipy.special.erf(x / math.sqrt(2.0)))


def _round_up(x, m):
    return (x + m - 1) // m * m


# ---------------------------------------------------------------------------
# Fused transformer-layer kernel: one grid step == one chunk of batch elements
# ---------------------------------------------------------------------------
def transformer_layer_kernel(
    x_ref,                                   # (T, Bb*E)   seq-first, batches in lanes
    ln1_g, ln1_b,
    wq_h, bq_h, wk_h, bk_h, wv_h, bv_h,      # (H, E, hd) / (H, 1, hd)
    bias_k_h, bias_v_h,                      # (H, 1, hd)  add_bias_kv vectors per head
    wo_h, bo,                                # (H, hd, E) / (1, E)
    ln2_g, ln2_b,
    w1, b1, w2, b2,                          # (E, F)/(1, F)/(F, E)/(1, E)
    out_ref,                                 # (T, Bb*E)
    attn_ref,                                # (Bb, T, S_pad)   lane-dense padded
    *, num_heads, batch_block, compute_dtype,
):
    T = x_ref.shape[0]
    E = ln1_g.shape[-1]
    hd = E // num_heads
    S_pad = attn_ref.shape[-1]
    scaling = 1.0 / math.sqrt(hd)
    inv_heads = 1.0 / num_heads

    def mm(a, bmat):
        return jnp.dot(a.astype(compute_dtype), bmat.astype(compute_dtype),
                       preferred_element_type=jnp.float32)

    def mm_nt(a, bmat):
        # a @ bmat.T without materializing the transpose (contract last dims)
        return jax.lax.dot_general(
            a.astype(compute_dtype), bmat.astype(compute_dtype),
            dimension_numbers=(((1,), (1,)), ((), ())),
            preferred_element_type=jnp.float32)

    g1, be1 = ln1_g[...], ln1_b[...]
    g2, be2 = ln2_g[...], ln2_b[...]
    w1v, b1v = w1[...], b1[...]
    w2v, b2v = w2[...], b2[...]
    bov = bo[...]

    x_all = x_ref[...]                       # (T, Bb*E)
    y_blocks = []

    for b in range(batch_block):             # static sublane-chunk loop (Bb <= 8 or == B)
        x = x_all[:, b * E:(b + 1) * E]      # (T, E) static lane slice

        # ---- self-attention branch (pre-LN) ----
        xn = _layernorm(x, g1, be1)

        def head_body(h, carry):
            attn_out, p_acc, pb_acc = carry
            q = (mm(xn, wq_h[h]) + bq_h[h]) * scaling      # (T, hd)
            k = mm(xn, wk_h[h]) + bk_h[h]                  # (T, hd)
            v = mm(xn, wv_h[h]) + bv_h[h]                  # (T, hd)

            s = mm_nt(q, k)                                # (T, T) scores
            # add_bias_kv=True: one extra key column (rank-1), no K concat needed
            sb = jnp.sum(q * bias_k_h[h], axis=-1, keepdims=True)   # (T, 1)

            m = jnp.maximum(jnp.max(s, axis=-1, keepdims=True), sb)
            p = jnp.exp(s - m)
            pb = jnp.exp(sb - m)
            inv = pl.reciprocal(jnp.sum(p, axis=-1, keepdims=True) + pb, approx=True)
            p = p * inv
            pb = pb * inv

            ctx = mm(p, v) + pb * bias_v_h[h]              # (T, hd) incl. bias-value col
            attn_out = attn_out + mm(ctx, wo_h[h])         # accumulate output projection
            return attn_out, p_acc + p, pb_acc + pb

        attn_out, p_acc, pb_acc = jax.lax.fori_loop(
            0, num_heads, head_body,
            (jnp.zeros((T, E), jnp.float32),
             jnp.zeros((T, T), jnp.float32),
             jnp.zeros((T, 1), jnp.float32)))

        x1 = x + attn_out + bov                            # residual 1

        # ---- FFN branch (pre-LN) ----
        xn2 = _layernorm(x1, g2, be2)
        hmid = _gelu(mm(xn2, w1v) + b1v)
        y = x1 + mm(hmid, w2v) + b2v                       # residual 2
        y_blocks.append(y)

        # head-averaged attention map, padded to a lane-dense width
        pieces = [p_acc * inv_heads, pb_acc * inv_heads]
        if S_pad > T + 1:
            pieces.append(jnp.zeros((T, S_pad - T - 1), jnp.float32))
        attn_ref[b] = jnp.concatenate(pieces, axis=-1).astype(attn_ref.dtype)

    out_ref[...] = jnp.concatenate(y_blocks, axis=-1).astype(out_ref.dtype)


# ---------------------------------------------------------------------------
# Param preparation: head-major weight layout (done once, outside the kernel)
# ---------------------------------------------------------------------------
def prepare_params(params, num_heads):
    E = params["wq"].shape[0]
    hd = E // num_heads

    def w_heads(w):        # (E, H*hd) -> (H, E, hd)
        return jnp.transpose(w.reshape(E, num_heads, hd), (1, 0, 2))

    def b_heads(b):        # (1, H*hd) -> (H, 1, hd)
        return jnp.transpose(b.reshape(1, num_heads, hd), (1, 0, 2))

    return {
        "ln1_g": params["ln1_g"], "ln1_b": params["ln1_b"],
        "wq_h": w_heads(params["wq"]), "bq_h": b_heads(params["bq"]),
        "wk_h": w_heads(params["wk"]), "bk_h": b_heads(params["bk"]),
        "wv_h": w_heads(params["wv"]), "bv_h": b_heads(params["bv"]),
        "bias_k_h": b_heads(params["bias_k"]),
        "bias_v_h": b_heads(params["bias_v"]),
        "wo_h": params["wo"].reshape(num_heads, hd, E),     # pure reshape (row-major)
        "bo": params["bo"],
        "ln2_g": params["ln2_g"], "ln2_b": params["ln2_b"],
        "w1": params["w1"], "b1": params["b1"],
        "w2": params["w2"], "b2": params["b2"],
    }


# ---------------------------------------------------------------------------
# Wrapper: BlockSpecs, grid, lane-dense output handling
# ---------------------------------------------------------------------------
def transformer_layer(x_tbe, kparams, num_heads, compute_dtype=jnp.float32):
    T, B, E = x_tbe.shape
    hd = E // num_heads
    F = kparams["w1"].shape[1]
    S = T + 1
    S_pad = _round_up(S, 128)

    # batch chunk per grid step: chunks of 8 when that keeps the lane block 128-aligned,
    # otherwise the whole (small) batch in one step.
    if B % 8 == 0 and (8 * E) % 128 == 0:
        Bb = 8
    else:
        Bb = B
    grid = (B // Bb,)

    # free row-major reshape (no transpose, no HBM round trip)
    x2d = x_tbe.reshape(T, B * E)

    def const_spec(shape):
        zeros = (0,) * len(shape)
        return pl.BlockSpec(shape, lambda i: zeros)

    in_specs = [
        pl.BlockSpec((T, Bb * E), lambda i: (0, i)),                       # x
        const_spec((1, E)), const_spec((1, E)),                            # ln1
        const_spec((num_heads, E, hd)), const_spec((num_heads, 1, hd)),    # wq_h, bq_h
        const_spec((num_heads, E, hd)), const_spec((num_heads, 1, hd)),    # wk_h, bk_h
        const_spec((num_heads, E, hd)), const_spec((num_heads, 1, hd)),    # wv_h, bv_h
        const_spec((num_heads, 1, hd)), const_spec((num_heads, 1, hd)),    # bias_k/v
        const_spec((num_heads, hd, E)), const_spec((1, E)),                # wo_h, bo
        const_spec((1, E)), const_spec((1, E)),                            # ln2
        const_spec((E, F)), const_spec((1, F)),                            # w1, b1
        const_spec((F, E)), const_spec((1, E)),                            # w2, b2
    ]
    out_specs = [
        pl.BlockSpec((T, Bb * E), lambda i: (0, i)),                       # hidden (T, B*E)
        pl.BlockSpec((Bb, T, S_pad), lambda i: (i, 0, 0)),                 # padded attn map
    ]
    out_shape = [
        jax.ShapeDtypeStruct((T, B * E), jnp.float32),
        jax.ShapeDtypeStruct((B, T, S_pad), jnp.float32),
    ]

    # explicit VMEM budget: resident weights + (double-buffered) activation blocks
    fp32 = 4
    weight_bytes = (4 * E * E + 2 * E * F + 10 * E + 2 * F) * fp32
    act_bytes = (2 * T * Bb * E + Bb * T * S_pad + T * F + 6 * T * E + 2 * T * T) * fp32
    vmem_limit = int(min(96 * 2 ** 20, max(32 * 2 ** 20, 2 * (weight_bytes + act_bytes))))

    kernel = functools.partial(
        transformer_layer_kernel,
        num_heads=num_heads, batch_block=Bb, compute_dtype=compute_dtype)

    out2d, attn_pad = pl.pallas_call(
        kernel,
        grid=grid,
        in_specs=in_specs,
        out_specs=out_specs,
        out_shape=out_shape,
        compiler_params=pltpu.CompilerParams(
            dimension_semantics=("parallel",),
            vmem_limit_bytes=vmem_limit,
        ),
    )(
        x2d,
        kparams["ln1_g"], kparams["ln1_b"],
        kparams["wq_h"], kparams["bq_h"],
        kparams["wk_h"], kparams["bk_h"],
        kparams["wv_h"], kparams["bv_h"],
        kparams["bias_k_h"], kparams["bias_v_h"],
        kparams["wo_h"], kparams["bo"],
        kparams["ln2_g"], kparams["ln2_b"],
        kparams["w1"], kparams["b1"],
        kparams["w2"], kparams["b2"],
    )

    out = out2d.reshape(T, B, E)           # free reshape back to seq-first layout
    return out, attn_pad[..., :S]          # drop the lane padding of the attn map


# ---------------------------------------------------------------------------
# Pure-JAX reference (standard, non-head-major params)
# ---------------------------------------------------------------------------
def reference(x_tbe, params, num_heads):
    T, B, E = x_tbe.shape
    hd = E // num_heads
    x = jnp.transpose(x_tbe, (1, 0, 2))                  # (B,T,E)

    def ln(v, g, b):
        mu = v.mean(-1, keepdims=True)
        var = ((v - mu) ** 2).mean(-1, keepdims=True)
        return (v - mu) / jnp.sqrt(var + 1e-5) * g + b

    xn = ln(x, params["ln1_g"], params["ln1_b"])
    q = (xn @ params["wq"] + params["bq"]) / math.sqrt(hd)
    k = xn @ params["wk"] + params["bk"]
    v = xn @ params["wv"] + params["bv"]
    k = jnp.concatenate([k, jnp.broadcast_to(params["bias_k"], (B, 1, E))], 1)
    v = jnp.concatenate([v, jnp.broadcast_to(params["bias_v"], (B, 1, E))], 1)
    qh = q.reshape(B, T, num_heads, hd).transpose(0, 2, 1, 3)
    kh = k.reshape(B, T + 1, num_heads, hd).transpose(0, 2, 1, 3)
    vh = v.reshape(B, T + 1, num_heads, hd).transpose(0, 2, 1, 3)
    s = jnp.einsum("bhtd,bhsd->bhts", qh, kh)
    p = jax.nn.softmax(s, -1)
    ctx = jnp.einsum("bhts,bhsd->bhtd", p, vh).transpose(0, 2, 1, 3).reshape(B, T, E)
    x1 = x + (ctx @ params["wo"] + params["bo"])
    xn2 = ln(x1, params["ln2_g"], params["ln2_b"])
    h1 = xn2 @ params["w1"] + params["b1"]
    h1 = h1 * 0.5 * (1.0 + jax.scipy.special.erf(h1 / math.sqrt(2.0)))
    out = x1 + (h1 @ params["w2"] + params["b2"])
    return jnp.transpose(out, (1, 0, 2)), p.mean(1)


# ---------------------------------------------------------------------------
if __name__ == "__main__":
    T, B, E, H, F = 8, 2, 32, 4, 64       # seq, batch, embed, heads, ffn

    key = jax.random.PRNGKey(0)
    keys = jax.random.split(key, 12)

    def w(k, shape, scale=0.05):
        return (scale * jax.random.normal(k, shape)).astype(jnp.float32)

    params = {
        "ln1_g": jnp.ones((1, E), jnp.float32),
        "ln1_b": jnp.zeros((1, E), jnp.float32),
        "wq": w(keys[0], (E, E)), "bq": jnp.zeros((1, E), jnp.float32),
        "wk": w(keys[1], (E, E)), "bk": jnp.zeros((1, E), jnp.float32),
        "wv": w(keys[2], (E, E)), "bv": jnp.zeros((1, E), jnp.float32),
        "bias_k": w(keys[3], (1, E)),
        "bias_v": w(keys[4], (1, E)),
        "wo": w(keys[5], (E, E)), "bo": jnp.zeros((1, E), jnp.float32),
        "ln2_g": jnp.ones((1, E), jnp.float32),
        "ln2_b": jnp.zeros((1, E), jnp.float32),
        "w1": w(keys[6], (E, F)), "b1": jnp.zeros((1, F), jnp.float32),
        "w2": w(keys[7], (F, E)), "b2": jnp.zeros((1, E), jnp.float32),
    }

    x = jax.random.normal(keys[8], (T, B, E), jnp.float32)

    # one-time conversion to the kernel's head-major weight layout
    kparams = prepare_params(params, H)

    fn = jax.jit(functools.partial(transformer_layer, num_heads=H))
    out, attn = fn(x, kparams)
    out = jax.block_until_ready(out)
    attn = jax.block_until_ready(attn)

    ref_out, ref_attn = reference(x, params, H)
    assert out.shape == (T, B, E) and attn.shape == (B, T, T + 1)
    assert jnp.allclose(out, ref_out, atol=2e-3, rtol=2e-3)
    assert jnp.allclose(attn, ref_attn, atol=2e-3, rtol=2e-3)

    print("KERNEL_OK")
</pallas_src>

<mosaic_0001>
module attributes {stable_mosaic.version = 11 : i64} {
  func.func @transformer_layer_kernel(%arg0: i32, %arg1: memref<8x64xf32, #tpu.memory_space<vmem>>, %arg2: memref<1x32xf32, #tpu.memory_space<vmem>>, %arg3: memref<1x32xf32, #tpu.memory_space<vmem>>, %arg4: memref<4x32x8xf32, #tpu.memory_space<vmem>>, %arg5: memref<4x1x8xf32, #tpu.memory_space<vmem>>, %arg6: memref<4x32x8xf32, #tpu.memory_space<vmem>>, %arg7: memref<4x1x8xf32, #tpu.memory_space<vmem>>, %arg8: memref<4x32x8xf32, #tpu.memory_space<vmem>>, %arg9: memref<4x1x8xf32, #tpu.memory_space<vmem>>, %arg10: memref<4x1x8xf32, #tpu.memory_space<vmem>>, %arg11: memref<4x1x8xf32, #tpu.memory_space<vmem>>, %arg12: memref<4x8x32xf32, #tpu.memory_space<vmem>>, %arg13: memref<1x32xf32, #tpu.memory_space<vmem>>, %arg14: memref<1x32xf32, #tpu.memory_space<vmem>>, %arg15: memref<1x32xf32, #tpu.memory_space<vmem>>, %arg16: memref<32x64xf32, #tpu.memory_space<vmem>>, %arg17: memref<1x64xf32, #tpu.memory_space<vmem>>, %arg18: memref<64x32xf32, #tpu.memory_space<vmem>>, %arg19: memref<1x32xf32, #tpu.memory_space<vmem>>, %arg20: memref<8x64xf32, #tpu.memory_space<vmem>>, %arg21: memref<2x8x128xf32, #tpu.memory_space<vmem>>) attributes {dimension_semantics = [#tpu.dimension_semantics<parallel>], iteration_bounds = array<i64: 1>, scalar_prefetch = 0 : i64, scratch_operands = 0 : i64, tpu.core_type = #tpu.core_type<tc>, window_params = [{transform_indices = @transform_0, window_bounds = array<i64: 8, 64>}, {pipeline_mode = #tpu.pipeline_mode<synchronous>, transform_indices = @transform_1, window_bounds = array<i64: 1, 32>}, {pipeline_mode = #tpu.pipeline_mode<synchronous>, transform_indices = @transform_2, window_bounds = array<i64: 1, 32>}, {pipeline_mode = #tpu.pipeline_mode<synchronous>, transform_indices = @transform_3, window_bounds = array<i64: 4, 32, 8>}, {pipeline_mode = #tpu.pipeline_mode<synchronous>, transform_indices = @transform_4, window_bounds = array<i64: 4, 1, 8>}, {pipeline_mode = #tpu.pipeline_mode<synchronous>, transform_indices = @transform_5, window_bounds = array<i64: 4, 32, 8>}, {pipeline_mode = #tpu.pipeline_mode<synchronous>, transform_indices = @transform_6, window_bounds = array<i64: 4, 1, 8>}, {pipeline_mode = #tpu.pipeline_mode<synchronous>, transform_indices = @transform_7, window_bounds = array<i64: 4, 32, 8>}, {pipeline_mode = #tpu.pipeline_mode<synchronous>, transform_indices = @transform_8, window_bounds = array<i64: 4, 1, 8>}, {pipeline_mode = #tpu.pipeline_mode<synchronous>, transform_indices = @transform_9, window_bounds = array<i64: 4, 1, 8>}, {pipeline_mode = #tpu.pipeline_mode<synchronous>, transform_indices = @transform_10, window_bounds = array<i64: 4, 1, 8>}, {pipeline_mode = #tpu.pipeline_mode<synchronous>, transform_indices = @transform_11, window_bounds = array<i64: 4, 8, 32>}, {pipeline_mode = #tpu.pipeline_mode<synchronous>, transform_indices = @transform_12, window_bounds = array<i64: 1, 32>}, {pipeline_mode = #tpu.pipeline_mode<synchronous>, transform_indices = @transform_13, window_bounds = array<i64: 1, 32>}, {pipeline_mode = #tpu.pipeline_mode<synchronous>, transform_indices = @transform_14, window_bounds = array<i64: 1, 32>}, {pipeline_mode = #tpu.pipeline_mode<synchronous>, transform_indices = @transform_15, window_bounds = array<i64: 32, 64>}, {pipeline_mode = #tpu.pipeline_mode<synchronous>, transform_indices = @transform_16, window_bounds = array<i64: 1, 64>}, {pipeline_mode = #tpu.pipeline_mode<synchronous>, transform_indices = @transform_17, window_bounds = array<i64: 64, 32>}, {pipeline_mode = #tpu.pipeline_mode<synchronous>, transform_indices = @transform_18, window_bounds = array<i64: 1, 32>}, {transform_indices = @transform_19, window_bounds = array<i64: 8, 64>}, {transform_indices = @transform_20, window_bounds = array<i64: 2, 8, 128>}]} {
    %c0 = arith.constant 0 : index
    %c0_0 = arith.constant 0 : index
    %0 = vector.load %arg2[%c0, %c0_0] : memref<1x32xf32, #tpu.memory_space<vmem>>, vector<1x32xf32>
    %c0_1 = arith.constant 0 : index
    %c0_2 = arith.constant 0 : index
    %1 = vector.load %arg3[%c0_1, %c0_2] : memref<1x32xf32, #tpu.memory_space<vmem>>, vector<1x32xf32>
    %c0_3 = arith.constant 0 : index
    %c0_4 = arith.constant 0 : index
    %2 = vector.load %arg14[%c0_3, %c0_4] : memref<1x32xf32, #tpu.memory_space<vmem>>, vector<1x32xf32>
    %c0_5 = arith.constant 0 : index
    %c0_6 = arith.constant 0 : index
    %3 = vector.load %arg15[%c0_5, %c0_6] : memref<1x32xf32, #tpu.memory_space<vmem>>, vector<1x32xf32>
    %c0_7 = arith.constant 0 : index
    %c0_8 = arith.constant 0 : index
    %4 = vector.load %arg16[%c0_7, %c0_8] : memref<32x64xf32, #tpu.memory_space<vmem>>, vector<32x64xf32>
    %c0_9 = arith.constant 0 : index
    %c0_10 = arith.constant 0 : index
    %5 = vector.load %arg17[%c0_9, %c0_10] : memref<1x64xf32, #tpu.memory_space<vmem>>, vector<1x64xf32>
    %c0_11 = arith.constant 0 : index
    %c0_12 = arith.constant 0 : index
    %6 = vector.load %arg18[%c0_11, %c0_12] : memref<64x32xf32, #tpu.memory_space<vmem>>, vector<64x32xf32>
    %c0_13 = arith.constant 0 : index
    %c0_14 = arith.constant 0 : index
    %7 = vector.load %arg19[%c0_13, %c0_14] : memref<1x32xf32, #tpu.memory_space<vmem>>, vector<1x32xf32>
    %c0_15 = arith.constant 0 : index
    %c0_16 = arith.constant 0 : index
    %8 = vector.load %arg13[%c0_15, %c0_16] : memref<1x32xf32, #tpu.memory_space<vmem>>, vector<1x32xf32>
    %c0_17 = arith.constant 0 : index
    %c0_18 = arith.constant 0 : index
    %9 = vector.load %arg1[%c0_17, %c0_18] : memref<8x64xf32, #tpu.memory_space<vmem>>, vector<8x64xf32>
    %10 = vector.extract_strided_slice %9 {offsets = [0, 0], sizes = [8, 32], strides = [1, 1]} : vector<8x64xf32> to vector<8x32xf32>
    %cst = arith.constant dense<0.000000e+00> : vector<8xf32>
    %11 = vector.multi_reduction <add>, %10, %cst [1] : vector<8x32xf32> to vector<8xf32>
    %12 = vector.shape_cast %11 : vector<8xf32> to vector<8x1xf32>
    %cst_19 = arith.constant 3.200000e+01 : f32
    %13 = vector.broadcast %cst_19 : f32 to vector<8x1xf32>
    %14 = arith.divf %12, %13 : vector<8x1xf32>
    %15 = vector.broadcast %14 : vector<8x1xf32> to vector<8x32xf32>
    %16 = arith.subf %10, %15 : vector<8x32xf32>
    %17 = arith.mulf %16, %16 : vector<8x32xf32>
    %cst_20 = arith.constant dense<0.000000e+00> : vector<8xf32>
    %18 = vector.multi_reduction <add>, %17, %cst_20 [1] : vector<8x32xf32> to vector<8xf32>
    %19 = vector.shape_cast %18 : vector<8xf32> to vector<8x1xf32>
    %cst_21 = arith.constant 3.200000e+01 : f32
    %20 = vector.broadcast %cst_21 : f32 to vector<8x1xf32>
    %21 = arith.divf %19, %20 : vector<8x1xf32>
    %22 = vector.broadcast %14 : vector<8x1xf32> to vector<8x32xf32>
    %23 = arith.subf %10, %22 : vector<8x32xf32>
    %cst_22 = arith.constant 9.99999974E-6 : f32
    %24 = vector.broadcast %cst_22 : f32 to vector<8x1xf32>
    %25 = arith.addf %21, %24 : vector<8x1xf32>
    %26 = math.rsqrt %25 : vector<8x1xf32>
    %27 = vector.broadcast %26 : vector<8x1xf32> to vector<8x32xf32>
    %28 = arith.mulf %23, %27 : vector<8x32xf32>
    %29 = vector.broadcast %0 : vector<1x32xf32> to vector<8x32xf32>
    %30 = arith.mulf %28, %29 : vector<8x32xf32>
    %31 = vector.broadcast %1 : vector<1x32xf32> to vector<8x32xf32>
    %32 = arith.addf %30, %31 : vector<8x32xf32>
    %cst_23 = arith.constant 0.000000e+00 : f32
    %33 = vector.broadcast %cst_23 : f32 to vector<8x32xf32>
    %cst_24 = arith.constant 0.000000e+00 : f32
    %34 = vector.broadcast %cst_24 : f32 to vector<8x8xf32>
    %cst_25 = arith.constant 0.000000e+00 : f32
    %35 = vector.broadcast %cst_25 : f32 to vector<8x1xf32>
    %c0_i32 = arith.constant 0 : i32
    %c4_i32 = arith.constant 4 : i32
    %36 = arith.addi %c0_i32, %c4_i32 : i32
    %c1_i32 = arith.constant 1 : i32
    %37:3 = scf.for %arg22 = %c0_i32 to %36 step %c1_i32 iter_args(%arg23 = %33, %arg24 = %34, %arg25 = %35) -> (vector<8x32xf32>, vector<8x8xf32>, vector<8x1xf32>)  : i32 {
      %166 = arith.index_cast %arg22 : i32 to index
      %c0_72 = arith.constant 0 : index
      %c0_73 = arith.constant 0 : index
      %167 = vector.load %arg4[%166, %c0_72, %c0_73] : memref<4x32x8xf32, #tpu.memory_space<vmem>>, vector<1x32x8xf32>
      %168 = vector.shape_cast %167 : vector<1x32x8xf32> to vector<32x8xf32>
      %cst_74 = arith.constant dense<0.000000e+00> : vector<8x8xf32>
      %169 = tpu.matmul %32, %168, %cst_74 {dimension_numbers = #tpu.dot_dimension_numbers<[1], [0], [0], [1], [0, 0, 1, 1], [], []>} : vector<8x32xf32>, vector<32x8xf32>, vector<8x8xf32> -> vector<8x8xf32>
      %170 = arith.index_cast %arg22 : i32 to index
      %c0_75 = arith.constant 0 : index
      %c0_76 = arith.constant 0 : index
      %171 = vector.load %arg5[%170, %c0_75, %c0_76] : memref<4x1x8xf32, #tpu.memory_space<vmem>>, vector<1x1x8xf32>
      %172 = vector.shape_cast %171 : vector<1x1x8xf32> to vector<1x8xf32>
      %173 = vector.broadcast %172 : vector<1x8xf32> to vector<8x8xf32>
      %174 = arith.addf %169, %173 : vector<8x8xf32>
      %cst_77 = arith.constant 0.353553385 : f32
      %175 = vector.broadcast %cst_77 : f32 to vector<8x8xf32>
      %176 = arith.mulf %174, %175 : vector<8x8xf32>
      %177 = arith.index_cast %arg22 : i32 to index
      %c0_78 = arith.constant 0 : index
      %c0_79 = arith.constant 0 : index
      %178 = vector.load %arg6[%177, %c0_78, %c0_79] : memref<4x32x8xf32, #tpu.memory_space<vmem>>, vector<1x32x8xf32>
      %179 = vector.shape_cast %178 : vector<1x32x8xf32> to vector<32x8xf32>
      %cst_80 = arith.constant dense<0.000000e+00> : vector<8x8xf32>
      %180 = tpu.matmul %32, %179, %cst_80 {dimension_numbers = #tpu.dot_dimension_numbers<[1], [0], [0], [1], [0, 0, 1, 1], [], []>} : vector<8x32xf32>, vector<32x8xf32>, vector<8x8xf32> -> vector<8x8xf32>
      %181 = arith.index_cast %arg22 : i32 to index
      %c0_81 = arith.constant 0 : index
      %c0_82 = arith.constant 0 : index
      %182 = vector.load %arg7[%181, %c0_81, %c0_82] : memref<4x1x8xf32, #tpu.memory_space<vmem>>, vector<1x1x8xf32>
      %183 = vector.shape_cast %182 : vector<1x1x8xf32> to vector<1x8xf32>
      %184 = vector.broadcast %183 : vector<1x8xf32> to vector<8x8xf32>
      %185 = arith.addf %180, %184 : vector<8x8xf32>
      %186 = arith.index_cast %arg22 : i32 to index
      %c0_83 = arith.constant 0 : index
      %c0_84 = arith.constant 0 : index
      %187 = vector.load %arg8[%186, %c0_83, %c0_84] : memref<4x32x8xf32, #tpu.memory_space<vmem>>, vector<1x32x8xf32>
      %188 = vector.shape_cast %187 : vector<1x32x8xf32> to vector<32x8xf32>
      %cst_85 = arith.constant dense<0.000000e+00> : vector<8x8xf32>
      %189 = tpu.matmul %32, %188, %cst_85 {dimension_numbers = #tpu.dot_dimension_numbers<[1], [0], [0], [1], [0, 0, 1, 1], [], []>} : vector<8x32xf32>, vector<32x8xf32>, vector<8x8xf32> -> vector<8x8xf32>
      %190 = arith.index_cast %arg22 : i32 to index
      %c0_86 = arith.constant 0 : index
      %c0_87 = arith.constant 0 : index
      %191 = vector.load %arg9[%190, %c0_86, %c0_87] : memref<4x1x8xf32, #tpu.memory_space<vmem>>, vector<1x1x8xf32>
      %192 = vector.shape_cast %191 : vector<1x1x8xf32> to vector<1x8xf32>
      %193 = vector.broadcast %192 : vector<1x8xf32> to vector<8x8xf32>
      %194 = arith.addf %189, %193 : vector<8x8xf32>
      %cst_88 = arith.constant dense<0.000000e+00> : vector<8x8xf32>
      %195 = tpu.matmul %176, %185, %cst_88 {dimension_numbers = #tpu.dot_dimension_numbers<[1], [1], [0], [0], [0, 0, 1, 0], [], []>} : vector<8x8xf32>, vector<8x8xf32>, vector<8x8xf32> -> vector<8x8xf32>
      %196 = arith.index_cast %arg22 : i32 to index
      %c0_89 = arith.constant 0 : index
      %c0_90 = arith.constant 0 : index
      %197 = vector.load %arg10[%196, %c0_89, %c0_90] : memref<4x1x8xf32, #tpu.memory_space<vmem>>, vector<1x1x8xf32>
      %198 = vector.shape_cast %197 : vector<1x1x8xf32> to vector<1x8xf32>
      %199 = vector.broadcast %198 : vector<1x8xf32> to vector<8x8xf32>
      %200 = arith.mulf %176, %199 : vector<8x8xf32>
      %cst_91 = arith.constant dense<0.000000e+00> : vector<8xf32>
      %201 = vector.multi_reduction <add>, %200, %cst_91 [1] : vector<8x8xf32> to vector<8xf32>
      %202 = vector.shape_cast %201 : vector<8xf32> to vector<8x1xf32>
      %cst_92 = arith.constant dense<0xFF800000> : vector<8xf32>
      %203 = vector.multi_reduction <maximumf>, %195, %cst_92 [1] : vector<8x8xf32> to vector<8xf32>
      %204 = vector.shape_cast %203 : vector<8xf32> to vector<8x1xf32>
      %205 = arith.maximumf %204, %202 : vector<8x1xf32>
      %206 = vector.broadcast %205 : vector<8x1xf32> to vector<8x8xf32>
      %207 = arith.subf %195, %206 : vector<8x8xf32>
      %208 = math.exp %207 : vector<8x8xf32>
      %209 = arith.subf %202, %205 : vector<8x1xf32>
      %210 = math.exp %209 : vector<8x1xf32>
      %cst_93 = arith.constant dense<0.000000e+00> : vector<8xf32>
      %211 = vector.multi_reduction <add>, %208, %cst_93 [1] : vector<8x8xf32> to vector<8xf32>
      %212 = vector.shape_cast %211 : vector<8xf32> to vector<8x1xf32>
      %213 = arith.addf %212, %210 : vector<8x1xf32>
      %214 = tpu.reciprocal %213 {approx = true} : vector<8x1xf32> -> vector<8x1xf32>
      %215 = vector.broadcast %214 : vector<8x1xf32> to vector<8x8xf32>
      %216 = arith.mulf %208, %215 : vector<8x8xf32>
      %217 = arith.mulf %210, %214 : vector<8x1xf32>
      %cst_94 = arith.constant dense<0.000000e+00> : vector<8x8xf32>
      %218 = tpu.matmul %216, %194, %cst_94 {dimension_numbers = #tpu.dot_dimension_numbers<[1], [0], [0], [1], [0, 0, 1, 1], [], []>} : vector<8x8xf32>, vector<8x8xf32>, vector<8x8xf32> -> vector<8x8xf32>
      %219 = arith.index_cast %arg22 : i32 to index
      %c0_95 = arith.constant 0 : index
      %c0_96 = arith.constant 0 : index
      %220 = vector.load %arg11[%219, %c0_95, %c0_96] : memref<4x1x8xf32, #tpu.memory_space<vmem>>, vector<1x1x8xf32>
      %221 = vector.shape_cast %220 : vector<1x1x8xf32> to vector<1x8xf32>
      %222 = vector.broadcast %217 : vector<8x1xf32> to vector<8x8xf32>
      %223 = vector.broadcast %221 : vector<1x8xf32> to vector<8x8xf32>
      %224 = arith.mulf %222, %223 : vector<8x8xf32>
      %225 = arith.addf %218, %224 : vector<8x8xf32>
      %226 = arith.index_cast %arg22 : i32 to index
      %c0_97 = arith.constant 0 : index
      %c0_98 = arith.constant 0 : index
      %227 = vector.load %arg12[%226, %c0_97, %c0_98] : memref<4x8x32xf32, #tpu.memory_space<vmem>>, vector<1x8x32xf32>
      %228 = vector.shape_cast %227 : vector<1x8x32xf32> to vector<8x32xf32>
      %cst_99 = arith.constant dense<0.000000e+00> : vector<8x32xf32>
      %229 = tpu.matmul %225, %228, %cst_99 {dimension_numbers = #tpu.dot_dimension_numbers<[1], [0], [0], [1], [0, 0, 1, 1], [], []>} : vector<8x8xf32>, vector<8x32xf32>, vector<8x32xf32> -> vector<8x32xf32>
      %230 = arith.addf %arg23, %229 : vector<8x32xf32>
      %231 = arith.addf %arg24, %216 : vector<8x8xf32>
      %232 = arith.addf %arg25, %217 : vector<8x1xf32>
      scf.yield %230, %231, %232 : vector<8x32xf32>, vector<8x8xf32>, vector<8x1xf32>
    }
    %c4_i32_26 = arith.constant 4 : i32
    %38 = arith.addf %10, %37#0 : vector<8x32xf32>
    %39 = vector.broadcast %8 : vector<1x32xf32> to vector<8x32xf32>
    %40 = arith.addf %38, %39 : vector<8x32xf32>
    %cst_27 = arith.constant dense<0.000000e+00> : vector<8xf32>
    %41 = vector.multi_reduction <add>, %40, %cst_27 [1] : vector<8x32xf32> to vector<8xf32>
    %42 = vector.shape_cast %41 : vector<8xf32> to vector<8x1xf32>
    %cst_28 = arith.constant 3.200000e+01 : f32
    %43 = vector.broadcast %cst_28 : f32 to vector<8x1xf32>
    %44 = arith.divf %42, %43 : vector<8x1xf32>
    %45 = vector.broadcast %44 : vector<8x1xf32> to vector<8x32xf32>
    %46 = arith.subf %40, %45 : vector<8x32xf32>
    %47 = arith.mulf %46, %46 : vector<8x32xf32>
    %cst_29 = arith.constant dense<0.000000e+00> : vector<8xf32>
    %48 = vector.multi_reduction <add>, %47, %cst_29 [1] : vector<8x32xf32> to vector<8xf32>
    %49 = vector.shape_cast %48 : vector<8xf32> to vector<8x1xf32>
    %cst_30 = arith.constant 3.200000e+01 : f32
    %50 = vector.broadcast %cst_30 : f32 to vector<8x1xf32>
    %51 = arith.divf %49, %50 : vector<8x1xf32>
    %52 = vector.broadcast %44 : vector<8x1xf32> to vector<8x32xf32>
    %53 = arith.subf %40, %52 : vector<8x32xf32>
    %cst_31 = arith.constant 9.99999974E-6 : f32
    %54 = vector.broadcast %cst_31 : f32 to vector<8x1xf32>
    %55 = arith.addf %51, %54 : vector<8x1xf32>
    %56 = math.rsqrt %55 : vector<8x1xf32>
    %57 = vector.broadcast %56 : vector<8x1xf32> to vector<8x32xf32>
    %58 = arith.mulf %53, %57 : vector<8x32xf32>
    %59 = vector.broadcast %2 : vector<1x32xf32> to vector<8x32xf32>
    %60 = arith.mulf %58, %59 : vector<8x32xf32>
    %61 = vector.broadcast %3 : vector<1x32xf32> to vector<8x32xf32>
    %62 = arith.addf %60, %61 : vector<8x32xf32>
    %cst_32 = arith.constant dense<0.000000e+00> : vector<8x64xf32>
    %63 = tpu.matmul %62, %4, %cst_32 {dimension_numbers = #tpu.dot_dimension_numbers<[1], [0], [0], [1], [0, 0, 1, 1], [], []>} : vector<8x32xf32>, vector<32x64xf32>, vector<8x64xf32> -> vector<8x64xf32>
    %64 = vector.broadcast %5 : vector<1x64xf32> to vector<8x64xf32>
    %65 = arith.addf %63, %64 : vector<8x64xf32>
    %cst_33 = arith.constant 5.000000e-01 : f32
    %66 = vector.broadcast %cst_33 : f32 to vector<8x64xf32>
    %67 = arith.mulf %65, %66 : vector<8x64xf32>
    %cst_34 = arith.constant 1.41421354 : f32
    %68 = vector.broadcast %cst_34 : f32 to vector<8x64xf32>
    %69 = arith.divf %65, %68 : vector<8x64xf32>
    %70 = math.erf %69 : vector<8x64xf32>
    %cst_35 = arith.constant 1.000000e+00 : f32
    %71 = vector.broadcast %cst_35 : f32 to vector<8x64xf32>
    %72 = arith.addf %71, %70 : vector<8x64xf32>
    %73 = arith.mulf %67, %72 : vector<8x64xf32>
    %cst_36 = arith.constant dense<0.000000e+00> : vector<8x32xf32>
    %74 = tpu.matmul %73, %6, %cst_36 {dimension_numbers = #tpu.dot_dimension_numbers<[1], [0], [0], [1], [0, 0, 1, 1], [], []>} : vector<8x64xf32>, vector<64x32xf32>, vector<8x32xf32> -> vector<8x32xf32>
    %75 = arith.addf %40, %74 : vector<8x32xf32>
    %76 = vector.broadcast %7 : vector<1x32xf32> to vector<8x32xf32>
    %77 = arith.addf %75, %76 : vector<8x32xf32>
    %cst_37 = arith.constant 2.500000e-01 : f32
    %78 = vector.broadcast %cst_37 : f32 to vector<8x8xf32>
    %79 = arith.mulf %37#1, %78 : vector<8x8xf32>
    %cst_38 = arith.constant 2.500000e-01 : f32
    %80 = vector.broadcast %cst_38 : f32 to vector<8x1xf32>
    %81 = arith.mulf %37#2, %80 : vector<8x1xf32>
    %cst_39 = arith.constant 0.000000e+00 : f32
    %82 = vector.broadcast %cst_39 : f32 to vector<8x119xf32>
    %83 = tpu.concatenate %79, %81, %82 in 1 : vector<8x8xf32>, vector<8x1xf32>, vector<8x119xf32> -> vector<8x128xf32>
    %c0_40 = arith.constant 0 : index
    %c0_41 = arith.constant 0 : index
    %c0_42 = arith.constant 0 : index
    %84 = vector.load %arg21[%c0_40, %c0_41, %c0_42] : memref<2x8x128xf32, #tpu.memory_space<vmem>>, vector<1x8x128xf32>
    %85 = vector.shape_cast %84 : vector<1x8x128xf32> to vector<8x128xf32>
    %86 = vector.shape_cast %83 : vector<8x128xf32> to vector<1x8x128xf32>
    tpu.vector_store %arg21[%c0_40, %c0_41, %c0_42], %86 {strides = array<i32>} : memref<2x8x128xf32, #tpu.memory_space<vmem>>, vector<1x8x128xf32>,
    %87 = vector.extract_strided_slice %9 {offsets = [0, 32], sizes = [8, 32], strides = [1, 1]} : vector<8x64xf32> to vector<8x32xf32>
    %cst_43 = arith.constant dense<0.000000e+00> : vector<8xf32>
    %88 = vector.multi_reduction <add>, %87, %cst_43 [1] : vector<8x32xf32> to vector<8xf32>
    %89 = vector.shape_cast %88 : vector<8xf32> to vector<8x1xf32>
    %cst_44 = arith.constant 3.200000e+01 : f32
    %90 = vector.broadcast %cst_44 : f32 to vector<8x1xf32>
    %91 = arith.divf %89, %90 : vector<8x1xf32>
    %92 = vector.broadcast %91 : vector<8x1xf32> to vector<8x32xf32>
    %93 = arith.subf %87, %92 : vector<8x32xf32>
    %94 = arith.mulf %93, %93 : vector<8x32xf32>
    %cst_45 = arith.constant dense<0.000000e+00> : vector<8xf32>
    %95 = vector.multi_reduction <add>, %94, %cst_45 [1] : vector<8x32xf32> to vector<8xf32>
    %96 = vector.shape_cast %95 : vector<8xf32> to vector<8x1xf32>
    %cst_46 = arith.constant 3.200000e+01 : f32
    %97 = vector.broadcast %cst_46 : f32 to vector<8x1xf32>
    %98 = arith.divf %96, %97 : vector<8x1xf32>
    %99 = vector.broadcast %91 : vector<8x1xf32> to vector<8x32xf32>
    %100 = arith.subf %87, %99 : vector<8x32xf32>
    %cst_47 = arith.constant 9.99999974E-6 : f32
    %101 = vector.broadcast %cst_47 : f32 to vector<8x1xf32>
    %102 = arith.addf %98, %101 : vector<8x1xf32>
    %103 = math.rsqrt %102 : vector<8x1xf32>
    %104 = vector.broadcast %103 : vector<8x1xf32> to vector<8x32xf32>
    %105 = arith.mulf %100, %104 : vector<8x32xf32>
    %106 = vector.broadcast %0 : vector<1x32xf32> to vector<8x32xf32>
    %107 = arith.mulf %105, %106 : vector<8x32xf32>
    %108 = vector.broadcast %1 : vector<1x32xf32> to vector<8x32xf32>
    %109 = arith.addf %107, %108 : vector<8x32xf32>
    %cst_48 = arith.constant 0.000000e+00 : f32
    %110 = vector.broadcast %cst_48 : f32 to vector<8x32xf32>
    %cst_49 = arith.constant 0.000000e+00 : f32
    %111 = vector.broadcast %cst_49 : f32 to vector<8x8xf32>
    %cst_50 = arith.constant 0.000000e+00 : f32
    %112 = vector.broadcast %cst_50 : f32 to vector<8x1xf32>
    %c0_i32_51 = arith.constant 0 : i32
    %c4_i32_52 = arith.constant 4 : i32
    %113 = arith.addi %c0_i32_51, %c4_i32_52 : i32
    %c1_i32_53 = arith.constant 1 : i32
    %114:3 = scf.for %arg22 = %c0_i32_51 to %113 step %c1_i32_53 iter_args(%arg23 = %110, %arg24 = %111, %arg25 = %112) -> (vector<8x32xf32>, vector<8x8xf32>, vector<8x1xf32>)  : i32 {
      %166 = arith.index_cast %arg22 : i32 to index
      %c0_72 = arith.constant 0 : index
      %c0_73 = arith.constant 0 : index
      %167 = vector.load %arg4[%166, %c0_72, %c0_73] : memref<4x32x8xf32, #tpu.memory_space<vmem>>, vector<1x32x8xf32>
      %168 = vector.shape_cast %167 : vector<1x32x8xf32> to vector<32x8xf32>
      %cst_74 = arith.constant dense<0.000000e+00> : vector<8x8xf32>
      %169 = tpu.matmul %109, %168, %cst_74 {dimension_numbers = #tpu.dot_dimension_numbers<[1], [0], [0], [1], [0, 0, 1, 1], [], []>} : vector<8x32xf32>, vector<32x8xf32>, vector<8x8xf32> -> vector<8x8xf32>
      %170 = arith.index_cast %arg22 : i32 to index
      %c0_75 = arith.constant 0 : index
      %c0_76 = arith.constant 0 : index
      %171 = vector.load %arg5[%170, %c0_75, %c0_76] : memref<4x1x8xf32, #tpu.memory_space<vmem>>, vector<1x1x8xf32>
      %172 = vector.shape_cast %171 : vector<1x1x8xf32> to vector<1x8xf32>
      %173 = vector.broadcast %172 : vector<1x8xf32> to vector<8x8xf32>
      %174 = arith.addf %169, %173 : vector<8x8xf32>
      %cst_77 = arith.constant 0.353553385 : f32
      %175 = vector.broadcast %cst_77 : f32 to vector<8x8xf32>
      %176 = arith.mulf %174, %175 : vector<8x8xf32>
      %177 = arith.index_cast %arg22 : i32 to index
      %c0_78 = arith.constant 0 : index
      %c0_79 = arith.constant 0 : index
      %178 = vector.load %arg6[%177, %c0_78, %c0_79] : memref<4x32x8xf32, #tpu.memory_space<vmem>>, vector<1x32x8xf32>
      %179 = vector.shape_cast %178 : vector<1x32x8xf32> to vector<32x8xf32>
      %cst_80 = arith.constant dense<0.000000e+00> : vector<8x8xf32>
      %180 = tpu.matmul %109, %179, %cst_80 {dimension_numbers = #tpu.dot_dimension_numbers<[1], [0], [0], [1], [0, 0, 1, 1], [], []>} : vector<8x32xf32>, vector<32x8xf32>, vector<8x8xf32> -> vector<8x8xf32>
      %181 = arith.index_cast %arg22 : i32 to index
      %c0_81 = arith.constant 0 : index
      %c0_82 = arith.constant 0 : index
      %182 = vector.load %arg7[%181, %c0_81, %c0_82] : memref<4x1x8xf32, #tpu.memory_space<vmem>>, vector<1x1x8xf32>
      %183 = vector.shape_cast %182 : vector<1x1x8xf32> to vector<1x8xf32>
      %184 = vector.broadcast %183 : vector<1x8xf32> to vector<8x8xf32>
      %185 = arith.addf %180, %184 : vector<8x8xf32>
      %186 = arith.index_cast %arg22 : i32 to index
      %c0_83 = arith.constant 0 : index
      %c0_84 = arith.constant 0 : index
      %187 = vector.load %arg8[%186, %c0_83, %c0_84] : memref<4x32x8xf32, #tpu.memory_space<vmem>>, vector<1x32x8xf32>
      %188 = vector.shape_cast %187 : vector<1x32x8xf32> to vector<32x8xf32>
      %cst_85 = arith.constant dense<0.000000e+00> : vector<8x8xf32>
      %189 = tpu.matmul %109, %188, %cst_85 {dimension_numbers = #tpu.dot_dimension_numbers<[1], [0], [0], [1], [0, 0, 1, 1], [], []>} : vector<8x32xf32>, vector<32x8xf32>, vector<8x8xf32> -> vector<8x8xf32>
      %190 = arith.index_cast %arg22 : i32 to index
      %c0_86 = arith.constant 0 : index
      %c0_87 = arith.constant 0 : index
      %191 = vector.load %arg9[%190, %c0_86, %c0_87] : memref<4x1x8xf32, #tpu.memory_space<vmem>>, vector<1x1x8xf32>
      %192 = vector.shape_cast %191 : vector<1x1x8xf32> to vector<1x8xf32>
      %193 = vector.broadcast %192 : vector<1x8xf32> to vector<8x8xf32>
      %194 = arith.addf %189, %193 : vector<8x8xf32>
      %cst_88 = arith.constant dense<0.000000e+00> : vector<8x8xf32>
      %195 = tpu.matmul %176, %185, %cst_88 {dimension_numbers = #tpu.dot_dimension_numbers<[1], [1], [0], [0], [0, 0, 1, 0], [], []>} : vector<8x8xf32>, vector<8x8xf32>, vector<8x8xf32> -> vector<8x8xf32>
      %196 = arith.index_cast %arg22 : i32 to index
      %c0_89 = arith.constant 0 : index
      %c0_90 = arith.constant 0 : index
      %197 = vector.load %arg10[%196, %c0_89, %c0_90] : memref<4x1x8xf32, #tpu.memory_space<vmem>>, vector<1x1x8xf32>
      %198 = vector.shape_cast %197 : vector<1x1x8xf32> to vector<1x8xf32>
      %199 = vector.broadcast %198 : vector<1x8xf32> to vector<8x8xf32>
      %200 = arith.mulf %176, %199 : vector<8x8xf32>
      %cst_91 = arith.constant dense<0.000000e+00> : vector<8xf32>
      %201 = vector.multi_reduction <add>, %200, %cst_91 [1] : vector<8x8xf32> to vector<8xf32>
      %202 = vector.shape_cast %201 : vector<8xf32> to vector<8x1xf32>
      %cst_92 = arith.constant dense<0xFF800000> : vector<8xf32>
      %203 = vector.multi_reduction <maximumf>, %195, %cst_92 [1] : vector<8x8xf32> to vector<8xf32>
      %204 = vector.shape_cast %203 : vector<8xf32> to vector<8x1xf32>
      %205 = arith.maximumf %204, %202 : vector<8x1xf32>
      %206 = vector.broadcast %205 : vector<8x1xf32> to vector<8x8xf32>
      %207 = arith.subf %195, %206 : vector<8x8xf32>
      %208 = math.exp %207 : vector<8x8xf32>
      %209 = arith.subf %202, %205 : vector<8x1xf32>
      %210 = math.exp %209 : vector<8x1xf32>
      %cst_93 = arith.constant dense<0.000000e+00> : vector<8xf32>
      %211 = vector.multi_reduction <add>, %208, %cst_93 [1] : vector<8x8xf32> to vector<8xf32>
      %212 = vector.shape_cast %211 : vector<8xf32> to vector<8x1xf32>
      %213 = arith.addf %212, %210 : vector<8x1xf32>
      %214 = tpu.reciprocal %213 {approx = true} : vector<8x1xf32> -> vector<8x1xf32>
      %215 = vector.broadcast %214 : vector<8x1xf32> to vector<8x8xf32>
      %216 = arith.mulf %208, %215 : vector<8x8xf32>
      %217 = arith.mulf %210, %214 : vector<8x1xf32>
      %cst_94 = arith.constant dense<0.000000e+00> : vector<8x8xf32>
      %218 = tpu.matmul %216, %194, %cst_94 {dimension_numbers = #tpu.dot_dimension_numbers<[1], [0], [0], [1], [0, 0, 1, 1], [], []>} : vector<8x8xf32>, vector<8x8xf32>, vector<8x8xf32> -> vector<8x8xf32>
      %219 = arith.index_cast %arg22 : i32 to index
      %c0_95 = arith.constant 0 : index
      %c0_96 = arith.constant 0 : index
      %220 = vector.load %arg11[%219, %c0_95, %c0_96] : memref<4x1x8xf32, #tpu.memory_space<vmem>>, vector<1x1x8xf32>
      %221 = vector.shape_cast %220 : vector<1x1x8xf32> to vector<1x8xf32>
      %222 = vector.broadcast %217 : vector<8x1xf32> to vector<8x8xf32>
      %223 = vector.broadcast %221 : vector<1x8xf32> to vector<8x8xf32>
      %224 = arith.mulf %222, %223 : vector<8x8xf32>
      %225 = arith.addf %218, %224 : vector<8x8xf32>
      %226 = arith.index_cast %arg22 : i32 to index
      %c0_97 = arith.constant 0 : index
      %c0_98 = arith.constant 0 : index
      %227 = vector.load %arg12[%226, %c0_97, %c0_98] : memref<4x8x32xf32, #tpu.memory_space<vmem>>, vector<1x8x32xf32>
      %228 = vector.shape_cast %227 : vector<1x8x32xf32> to vector<8x32xf32>
      %cst_99 = arith.constant dense<0.000000e+00> : vector<8x32xf32>
      %229 = tpu.matmul %225, %228, %cst_99 {dimension_numbers = #tpu.dot_dimension_numbers<[1], [0], [0], [1], [0, 0, 1, 1], [], []>} : vector<8x8xf32>, vector<8x32xf32>, vector<8x32xf32> -> vector<8x32xf32>
      %230 = arith.addf %arg23, %229 : vector<8x32xf32>
      %231 = arith.addf %arg24, %216 : vector<8x8xf32>
      %232 = arith.addf %arg25, %217 : vector<8x1xf32>
      scf.yield %230, %231, %232 : vector<8x32xf32>, vector<8x8xf32>, vector<8x1xf32>
    }
    %c4_i32_54 = arith.constant 4 : i32
    %115 = arith.addf %87, %114#0 : vector<8x32xf32>
    %116 = vector.broadcast %8 : vector<1x32xf32> to vector<8x32xf32>
    %117 = arith.addf %115, %116 : vector<8x32xf32>
    %cst_55 = arith.constant dense<0.000000e+00> : vector<8xf32>
    %118 = vector.multi_reduction <add>, %117, %cst_55 [1] : vector<8x32xf32> to vector<8xf32>
    %119 = vector.shape_cast %118 : vector<8xf32> to vector<8x1xf32>
    %cst_56 = arith.constant 3.200000e+01 : f32
    %120 = vector.broadcast %cst_56 : f32 to vector<8x1xf32>
    %121 = arith.divf %119, %120 : vector<8x1xf32>
    %122 = vector.broadcast %121 : vector<8x1xf32> to vector<8x32xf32>
    %123 = arith.subf %117, %122 : vector<8x32xf32>
    %124 = arith.mulf %123, %123 : vector<8x32xf32>
    %cst_57 = arith.constant dense<0.000000e+00> : vector<8xf32>
    %125 = vector.multi_reduction <add>, %124, %cst_57 [1] : vector<8x32xf32> to vector<8xf32>
    %126 = vector.shape_cast %125 : vector<8xf32> to vector<8x1xf32>
    %cst_58 = arith.constant 3.200000e+01 : f32
    %127 = vector.broadcast %cst_58 : f32 to vector<8x1xf32>
    %128 = arith.divf %126, %127 : vector<8x1xf32>
    %129 = vector.broadcast %121 : vector<8x1xf32> to vector<8x32xf32>
    %130 = arith.subf %117, %129 : vector<8x32xf32>
    %cst_59 = arith.constant 9.99999974E-6 : f32
    %131 = vector.broadcast %cst_59 : f32 to vector<8x1xf32>
    %132 = arith.addf %128, %131 : vector<8x1xf32>
    %133 = math.rsqrt %132 : vector<8x1xf32>
    %134 = vector.broadcast %133 : vector<8x1xf32> to vector<8x32xf32>
    %135 = arith.mulf %130, %134 : vector<8x32xf32>
    %136 = vector.broadcast %2 : vector<1x32xf32> to vector<8x32xf32>
    %137 = arith.mulf %135, %136 : vector<8x32xf32>
    %138 = vector.broadcast %3 : vector<1x32xf32> to vector<8x32xf32>
    %139 = arith.addf %137, %138 : vector<8x32xf32>
    %cst_60 = arith.constant dense<0.000000e+00> : vector<8x64xf32>
    %140 = tpu.matmul %139, %4, %cst_60 {dimension_numbers = #tpu.dot_dimension_numbers<[1], [0], [0], [1], [0, 0, 1, 1], [], []>} : vector<8x32xf32>, vector<32x64xf32>, vector<8x64xf32> -> vector<8x64xf32>
    %141 = vector.broadcast %5 : vector<1x64xf32> to vector<8x64xf32>
    %142 = arith.addf %140, %141 : vector<8x64xf32>
    %cst_61 = arith.constant 5.000000e-01 : f32
    %143 = vector.broadcast %cst_61 : f32 to vector<8x64xf32>
    %144 = arith.mulf %142, %143 : vector<8x64xf32>
    %cst_62 = arith.constant 1.41421354 : f32
    %145 = vector.broadcast %cst_62 : f32 to vector<8x64xf32>
    %146 = arith.divf %142, %145 : vector<8x64xf32>
    %147 = math.erf %146 : vector<8x64xf32>
    %cst_63 = arith.constant 1.000000e+00 : f32
    %148 = vector.broadcast %cst_63 : f32 to vector<8x64xf32>
    %149 = arith.addf %148, %147 : vector<8x64xf32>
    %150 = arith.mulf %144, %149 : vector<8x64xf32>
    %cst_64 = arith.constant dense<0.000000e+00> : vector<8x32xf32>
    %151 = tpu.matmul %150, %6, %cst_64 {dimension_numbers = #tpu.dot_dimension_numbers<[1], [0], [0], [1], [0, 0, 1, 1], [], []>} : vector<8x64xf32>, vector<64x32xf32>, vector<8x32xf32> -> vector<8x32xf32>
    %152 = arith.addf %117, %151 : vector<8x32xf32>
    %153 = vector.broadcast %7 : vector<1x32xf32> to vector<8x32xf32>
    %154 = arith.addf %152, %153 : vector<8x32xf32>
    %cst_65 = arith.constant 2.500000e-01 : f32
    %155 = vector.broadcast %cst_65 : f32 to vector<8x8xf32>
    %156 = arith.mulf %114#1, %155 : vector<8x8xf32>
    %cst_66 = arith.constant 2.500000e-01 : f32
    %157 = vector.broadcast %cst_66 : f32 to vector<8x1xf32>
    %158 = arith.mulf %114#2, %157 : vector<8x1xf32>
    %cst_67 = arith.constant 0.000000e+00 : f32
    %159 = vector.broadcast %cst_67 : f32 to vector<8x119xf32>
    %160 = tpu.concatenate %156, %158, %159 in 1 : vector<8x8xf32>, vector<8x1xf32>, vector<8x119xf32> -> vector<8x128xf32>
    %c1 = arith.constant 1 : index
    %c0_68 = arith.constant 0 : index
    %c0_69 = arith.constant 0 : index
    %161 = vector.load %arg21[%c1, %c0_68, %c0_69] : memref<2x8x128xf32, #tpu.memory_space<vmem>>, vector<1x8x128xf32>
    %162 = vector.shape_cast %161 : vector<1x8x128xf32> to vector<8x128xf32>
    %163 = vector.shape_cast %160 : vector<8x128xf32> to vector<1x8x128xf32>
    tpu.vector_store %arg21[%c1, %c0_68, %c0_69], %163 {strides = array<i32>} : memref<2x8x128xf32, #tpu.memory_space<vmem>>, vector<1x8x128xf32>,
    %164 = tpu.concatenate %77, %154 in 1 : vector<8x32xf32>, vector<8x32xf32> -> vector<8x64xf32>
    %c0_70 = arith.constant 0 : index
    %c0_71 = arith.constant 0 : index
    %165 = vector.load %arg20[%c0_70, %c0_71] : memref<8x64xf32, #tpu.memory_space<vmem>>, vector<8x64xf32>
    tpu.vector_store %arg20[%c0_70, %c0_71], %164 {strides = array<i32>} : memref<8x64xf32, #tpu.memory_space<vmem>>, vector<8x64xf32>,
    return
  }
  func.func @transform_0(%arg0: i32) -> (i32, i32) {
    %c0_i32 = arith.constant 0 : i32
    %c0_i32_0 = arith.constant 0 : i32
    return %c0_i32, %arg0 : i32, i32
  }
  func.func @transform_1(%arg0: i32) -> (i32, i32) {
    %c0_i32 = arith.constant 0 : i32
    %c0_i32_0 = arith.constant 0 : i32
    %c0_i32_1 = arith.constant 0 : i32
    return %c0_i32, %c0_i32_0 : i32, i32
  }
  func.func @transform_2(%arg0: i32) -> (i32, i32) {
    %c0_i32 = arith.constant 0 : i32
    %c0_i32_0 = arith.constant 0 : i32
    %c0_i32_1 = arith.constant 0 : i32
    return %c0_i32, %c0_i32_0 : i32, i32
  }
  func.func @transform_3(%arg0: i32) -> (i32, i32, i32) {
    %c0_i32 = arith.constant 0 : i32
    %c0_i32_0 = arith.constant 0 : i32
    %c0_i32_1 = arith.constant 0 : i32
    %c0_i32_2 = arith.constant 0 : i32
    return %c0_i32, %c0_i32_0, %c0_i32_1 : i32, i32, i32
  }
  func.func @transform_4(%arg0: i32) -> (i32, i32, i32) {
    %c0_i32 = arith.constant 0 : i32
    %c0_i32_0 = arith.constant 0 : i32
    %c0_i32_1 = arith.constant 0 : i32
    %c0_i32_2 = arith.constant 0 : i32
    return %c0_i32, %c0_i32_0, %c0_i32_1 : i32, i32, i32
  }
  func.func @transform_5(%arg0: i32) -> (i32, i32, i32) {
    %c0_i32 = arith.constant 0 : i32
    %c0_i32_0 = arith.constant 0 : i32
    %c0_i32_1 = arith.constant 0 : i32
    %c0_i32_2 = arith.constant 0 : i32
    return %c0_i32, %c0_i32_0, %c0_i32_1 : i32, i32, i32
  }
  func.func @transform_6(%arg0: i32) -> (i32, i32, i32) {
    %c0_i32 = arith.constant 0 : i32
    %c0_i32_0 = arith.constant 0 : i32
    %c0_i32_1 = arith.constant 0 : i32
    %c0_i32_2 = arith.constant 0 : i32
    return %c0_i32, %c0_i32_0, %c0_i32_1 : i32, i32, i32
  }
  func.func @transform_7(%arg0: i32) -> (i32, i32, i32) {
    %c0_i32 = arith.constant 0 : i32
    %c0_i32_0 = arith.constant 0 : i32
    %c0_i32_1 = arith.constant 0 : i32
    %c0_i32_2 = arith.constant 0 : i32
    return %c0_i32, %c0_i32_0, %c0_i32_1 : i32, i32, i32
  }
  func.func @transform_8(%arg0: i32) -> (i32, i32, i32) {
    %c0_i32 = arith.constant 0 : i32
    %c0_i32_0 = arith.constant 0 : i32
    %c0_i32_1 = arith.constant 0 : i32
    %c0_i32_2 = arith.constant 0 : i32
    return %c0_i32, %c0_i32_0, %c0_i32_1 : i32, i32, i32
  }
  func.func @transform_9(%arg0: i32) -> (i32, i32, i32) {
    %c0_i32 = arith.constant 0 : i32
    %c0_i32_0 = arith.constant 0 : i32
    %c0_i32_1 = arith.constant 0 : i32
    %c0_i32_2 = arith.constant 0 : i32
    return %c0_i32, %c0_i32_0, %c0_i32_1 : i32, i32, i32
  }
  func.func @transform_10(%arg0: i32) -> (i32, i32, i32) {
    %c0_i32 = arith.constant 0 : i32
    %c0_i32_0 = arith.constant 0 : i32
    %c0_i32_1 = arith.constant 0 : i32
    %c0_i32_2 = arith.constant 0 : i32
    return %c0_i32, %c0_i32_0, %c0_i32_1 : i32, i32, i32
  }
  func.func @transform_11(%arg0: i32) -> (i32, i32, i32) {
    %c0_i32 = arith.constant 0 : i32
    %c0_i32_0 = arith.constant 0 : i32
    %c0_i32_1 = arith.constant 0 : i32
    %c0_i32_2 = arith.constant 0 : i32
    return %c0_i32, %c0_i32_0, %c0_i32_1 : i32, i32, i32
  }
  func.func @transform_12(%arg0: i32) -> (i32, i32) {
    %c0_i32 = arith.constant 0 : i32
    %c0_i32_0 = arith.constant 0 : i32
    %c0_i32_1 = arith.constant 0 : i32
    return %c0_i32, %c0_i32_0 : i32, i32
  }
  func.func @transform_13(%arg0: i32) -> (i32, i32) {
    %c0_i32 = arith.constant 0 : i32
    %c0_i32_0 = arith.constant 0 : i32
    %c0_i32_1 = arith.constant 0 : i32
    return %c0_i32, %c0_i32_0 : i32, i32
  }
  func.func @transform_14(%arg0: i32) -> (i32, i32) {
    %c0_i32 = arith.constant 0 : i32
    %c0_i32_0 = arith.constant 0 : i32
    %c0_i32_1 = arith.constant 0 : i32
    return %c0_i32, %c0_i32_0 : i32, i32
  }
  func.func @transform_15(%arg0: i32) -> (i32, i32) {
    %c0_i32 = arith.constant 0 : i32
    %c0_i32_0 = arith.constant 0 : i32
    %c0_i32_1 = arith.constant 0 : i32
    return %c0_i32, %c0_i32_0 : i32, i32
  }
  func.func @transform_16(%arg0: i32) -> (i32, i32) {
    %c0_i32 = arith.constant 0 : i32
    %c0_i32_0 = arith.constant 0 : i32
    %c0_i32_1 = arith.constant 0 : i32
    return %c0_i32, %c0_i32_0 : i32, i32
  }
  func.func @transform_17(%arg0: i32) -> (i32, i32) {
    %c0_i32 = arith.constant 0 : i32
    %c0_i32_0 = arith.constant 0 : i32
    %c0_i32_1 = arith.constant 0 : i32
    return %c0_i32, %c0_i32_0 : i32, i32
  }
  func.func @transform_18(%arg0: i32) -> (i32, i32) {
    %c0_i32 = arith.constant 0 : i32
    %c0_i32_0 = arith.constant 0 : i32
    %c0_i32_1 = arith.constant 0 : i32
    return %c0_i32, %c0_i32_0 : i32, i32
  }
  func.func @transform_19(%arg0: i32) -> (i32, i32) {
    %c0_i32 = arith.constant 0 : i32
    %c0_i32_0 = arith.constant 0 : i32
    return %c0_i32, %arg0 : i32, i32
  }
  func.func @transform_20(%arg0: i32) -> (i32, i32, i32) {
    %c0_i32 = arith.constant 0 : i32
    %c0_i32_0 = arith.constant 0 : i32
    %c0_i32_1 = arith.constant 0 : i32
    return %arg0, %c0_i32, %c0_i32_0 : i32, i32, i32
  }
}

</mosaic_0001>

<bundles_post_ra>
// kernel: transformer_layer.1
= control target key start
LH: loop header
LB: loop body
LE: loop exit
PB: predicated region body
PF: predicated region fallthrough
CT: control target
= control target key end

     0   :  { %s2724_s0 = inlined_call_operand.vmem [shape: f32[8,64], index: 0, kind: input, shape index: {}]   ;;  %s2725_s1 = inlined_call_operand.vmem [shape: f32[1,32], index: 1, kind: input, shape index: {}]   ;;  %s2726_s2 = inlined_call_operand.vmem [shape: f32[1,32], index: 2, kind: input, shape index: {}]   ;;  %s2727_s3 = inlined_call_operand.vmem [shape: f32[4,32,8], index: 3, kind: input, shape index: {}]   ;;  %s2728_s4 = inlined_call_operand.vmem [shape: f32[4,1,8], index: 4, kind: input, shape index: {}]   ;;  %s2729_s5 = inlined_call_operand.vmem [shape: f32[4,32,8], index: 5, kind: input, shape index: {}]   ;;  %s2730_s6 = inlined_call_operand.vmem [shape: f32[4,1,8], index: 6, kind: input, shape index: {}]   ;;  %s2731_s7 = inlined_call_operand.vmem [shape: f32[4,32,8], index: 7, kind: input, shape index: {}]   ;;  %s2732_s8 = inlined_call_operand.vmem [shape: f32[4,1,8], index: 8, kind: input, shape index: {}]   ;;  %s2733_s9 = inlined_call_operand.vmem [shape: f32[4,1,8], index: 9, kind: input, shape index: {}]   ;;  %s2734_s10 = inlined_call_operand.vmem [shape: f32[4,1,8], index: 10, kind: input, shape index: {}]   ;;  %s2735_s11 = inlined_call_operand.vmem [shape: f32[4,8,32], index: 11, kind: input, shape index: {}]   ;;  %s2736_s12 = inlined_call_operand.vmem [shape: f32[1,32], index: 12, kind: input, shape index: {}]   ;;  %s2737_s13 = inlined_call_operand.vmem [shape: f32[1,32], index: 13, kind: input, shape index: {}]   ;;  %s2738_s14 = inlined_call_operand.vmem [shape: f32[1,32], index: 14, kind: input, shape index: {}]   ;;  %s2739_s15 = inlined_call_operand.vmem [shape: f32[32,64], index: 15, kind: input, shape index: {}]   ;;  %s2740_s16 = inlined_call_operand.vmem [shape: f32[1,64], index: 16, kind: input, shape index: {}]   ;;  %s2741_s17 = inlined_call_operand.vmem [shape: f32[64,32], index: 17, kind: input, shape index: {}]   ;;  %s2742_s18 = inlined_call_operand.vmem [shape: f32[1,32], index: 18, kind: input, shape index: {}]   ;;  %s2743_s19 = inlined_call_operand.vmem [shape: f32[8,64], index: 19, kind: output, shape index: {0}]   ;;  %s2744_s20 = inlined_call_operand.hbm [shape: f32[2,8,128], index: 20, kind: output, shape index: {1}]  }
   0x1   :  { %2745 = sst [smem:[#allocation5_spill]] %s2724_s0 }
   0x2   :  { %2746 = sst [smem:[#allocation6_spill]] %s2725_s1 }
   0x3   :  { %2747 = sst [smem:[#allocation7_spill]] %s2726_s2 }
   0x4   :  { %2748 = sst [smem:[#allocation8_spill]] %s2727_s3 }
   0x5   :  { %2749 = sst [smem:[#allocation9_spill]] %s2728_s4 }
   0x6   :  { %s2750_s23 = sld [smem:[#allocation5_spill]]  ;;  %vm85_vm0 = vcmask 261120  }
   0xc   :  { %v2266_v0 = vld [vmem:[%s2750_s23] sm:$0xff] }
   0xd   :  { %26 = vsyncpa [#allocation3], 0  ;;  %v86_v1 = vsel %vm85_vm0, %v2266_v0, 0.0  ;;  %v2275_v7 = vld [vmem:[%s2737_s13] ss:$0 sm:$0xff]  ;;  %v2290_v10 = vld [vmem:[%s2739_s15 + $0x8] sm:$0xff] }
   0xe   :  { %87 = vadd.xlane.f32.xlu0 %v86_v1  ;;  %v2280_v8 = vld [vmem:[%s2738_s14] ss:$0 sm:$0xff]  ;;  %v2295_v11 = vld [vmem:[%s2739_s15 + $0x10] sm:$0xff]  ;;  %v2300_v12 = vld [vmem:[%s2739_s15 + $0x18] sm:$0xff]  ;;  %s2751_s24 = sld [smem:[#allocation6_spill]]  ;;  %v2371_v33 = vmov 0.0  }
   0xf   :  { %v2285_v9 = vld [vmem:[%s2739_s15] sm:$0xff]  ;;  %v2315_v15 = vld [vmem:[%s2741_s17 + $0x8] sm:$0xff]  ;;  %v2320_v16 = vld [vmem:[%s2741_s17 + $0x10] sm:$0xff]  ;;  %v2373_v34 = vmov 0.0   ;;  %v2375_v35 = vmov 0.0  }
  0x10   :  { %v2305_v13 = vld [vmem:[%s2740_s16] ss:$0 sm:$0xff]  ;;  %v2325_v17 = vld [vmem:[%s2741_s17 + $0x18] sm:$0xff]  ;;  %v2335_v19 = vld [vmem:[%s2741_s17 + $0x28] sm:$0xff] }
  0x11   :  { %v2310_v14 = vld [vmem:[%s2741_s17] sm:$0xff]  ;;  %v2340_v20 = vld [vmem:[%s2741_s17 + $0x30] sm:$0xff]  ;;  %v2345_v21 = vld [vmem:[%s2741_s17 + $0x38] sm:$0xff] }
  0x12   :  { %v2330_v18 = vld [vmem:[%s2741_s17 + $0x20] sm:$0xff] }
  0x13   :  { %v2350_v22 = vld [vmem:[%s2742_s18] ss:$0 sm:$0xff]  ;;  %s2752_s18 = sld [smem:[#allocation7_spill]] }
  0x14   :  { %v2355_v23 = vld [vmem:[%s2736_s12] ss:$0 sm:$0xff]  ;;  %s2377_s12 = smov 0  }
  0x15   :  { %v2360_v28 = vld [vmem:[%s2751_s24] ss:$0 sm:$0xff] }
  0x19   :  { %v2365_v30 = vld [vmem:[%s2752_s18] ss:$0 sm:$0xff] }
  0x97   :  { %v88_v2 = vpop.xlane.xlu0 %87 }
  0x98   :  { %v90_v3 = vmul.f32 0.03125, %v88_v2 }
  0x9a   :  { %v91_v4 = vsub.f32 %v2266_v0, %v90_v3 }
  0x9c   :  { %v92_v5 = vmul.f32 %v91_v4, %v91_v4 }
  0x9e   :  { %v93_v6 = vsel %vm85_vm0, %v92_v5, 0.0 }
  0x9f   :  { %94 = vadd.xlane.f32.xlu0 %v93_v6 }
 0x128   :  { %v95_v24 = vpop.xlane.xlu0 %94 }
 0x129   :  { %v96_v25 = vmul.f32 0.03125, %v95_v24 }
 0x12b   :  { %v97_v26 = vadd.f32 1e-05, %v96_v25 }
 0x12d   :  { %2036 = vrsqrt.f32 %v97_v26 }
 0x13a   :  { %v2037_v27 = vpop.eup %2036 }
 0x13b   :  { %v99_v29 = vmul.f32 %v2037_v27, %v91_v4 }
 0x13d   :  { %v106_v31 = vmul.f32 %v2360_v28, %v99_v29 }
 0x13f   :  { %v2369_v32 = vadd.f32 %v2365_v30, %v106_v31 }
 0x140 LB: > { %v2146_v36 = vmov 0.0   ;;  %s2394_s25 = sshll.u32 %s2128_s12, 5  ;;  %vm2147_vm1 = vmmov 0   ;;  %s2753_s16 = sld [smem:[#allocation8_spill]]  ;;  %vm377_vm2 = vcmask 64512   ;;  %s2128_s12 = sphi %s2377_s12, %s119_s12   ;;  %v2124_v35 = vphi %v2375_v35, %v2759_v35   ;;  %v2120_v34 = vphi %v2373_v34, %v2758_v34   ;;  %v2116_v33 = vphi %v2371_v33, %v2757_v33  }
 0x141   : > { %1804 = vmatprep.subr.mxu0 %v2146_v36  ;;  %1815 = vmatprep.subr.mxu1 %v2146_v36  ;;  %s211_s4 = scalar_lea.vmem %s2729_s5, %s2394_s25  ;;  %s2754_s13 = sld [smem:[#allocation9_spill]] }
 0x142   : > { %1812 = vmatprep.mubr.msk.f32.mxu0 %vm2147_vm1, %v2146_v36  ;;  %1823 = vmatprep.mubr.msk.f32.mxu1 %vm2147_vm1, %v2146_v36  ;;  %v215_v38 = vld [vmem:[%s211_s4 + $0x18] sm:$0xff]  ;;  %v214_v40 = vld [vmem:[%s211_s4 + $0x10] sm:$0xff]  ;;  %v213_v42 = vld [vmem:[%s211_s4 + $0x8] sm:$0xff]  ;;  %s216_s1 = scalar_lea.vmem %s2730_s6, %s2128_s12  ;;  %s454_s24 = scalar_lea.vmem %s2733_s9, %s2128_s12 }
 0x143   : > { %1816 = vmatpush3.msra.mxu1 %v215_v38  ;;  %v212_v44 = vld [vmem:[%s211_s4] sm:$0xff]  ;;  %s294_s18 = scalar_lea.vmem %s2731_s7, %s2394_s25  ;;  %s299_s3 = scalar_lea.vmem %s2732_s8, %s2128_s12 }
 0x144   : > { %1817 = vmatprep.subr.mxu1 %v2146_v36  ;;  %v1700_v46 = vld [vmem:[%s216_s1] ss:$0 sm:$0xff]  ;;  %v298_v57 = vld [vmem:[%s294_s18 + $0x18] sm:$0xff]  ;;  %v297_v58 = vld [vmem:[%s294_s18 + $0x10] sm:$0xff]  ;;  %s483_s30 = scalar_lea.vmem %s2734_s10, %s2128_s12 }
 0x145   : > { %1818 = vmatpush3.msra.mxu1 %v214_v40  ;;  %v1706_v53 = vld [vmem:[%s454_s24] ss:$0 sm:$0xff]  ;;  %v296_v59 = vld [vmem:[%s294_s18 + $0x8] sm:$0xff] }
 0x146   : > { %s124_s26 = scalar_lea.vmem %s2753_s16, %s2394_s25  ;;  %1819 = vmatprep.subr.mxu1 %v2146_v36  ;;  %v295_v60 = vld [vmem:[%s294_s18] sm:$0xff]  ;;  %s1709_s16 = sshll.u32 %s2128_s12, 3 }
 0x147   : > { %v128_v37 = vld [vmem:[%s124_s26 + $0x18] sm:$0xff]  ;;  %v127_v39 = vld [vmem:[%s124_s26 + $0x10] sm:$0xff]  ;;  %v126_v41 = vld [vmem:[%s124_s26 + $0x8] sm:$0xff]  ;;  %1820 = vmatpush3.msra.mxu1 %v213_v42  ;;  %s129_s0 = scalar_lea.vmem %s2754_s13, %s2128_s12  ;;  %s566_s28 = scalar_lea.vmem %s2735_s11, %s1709_s16 }
 0x148   : > { %1805 = vmatpush3.msra.mxu0 %v128_v37  ;;  %v125_v43 = vld [vmem:[%s124_s26] sm:$0xff]  ;;  %1821 = vmatprep.subr.mxu1 %v2146_v36  ;;  %s119_s12 = sadd.s32 1, %s2128_s12  }
 0x149   : > { %1806 = vmatprep.subr.mxu0 %v2146_v36  ;;  %1822 = vmatpush3.msra.mxu1 %v212_v44  ;;  %v1698_v45 = vld [vmem:[%s129_s0] ss:$0 sm:$0xff]  ;;  %p116_p0 = scmp.ge.s32.totalorder %s119_s12, 4  }
 0x14a   : > { %1807 = vmatpush3.msra.mxu0 %v127_v39  ;;  %1824 = vmatmul.mubr.msk.f32.vlgmr.msra.gmra.mxu1 %vm85_vm0, %v2369_v32  ;;  %v1702_v27 = vld [vmem:[%s299_s3] ss:$0 sm:$0xff]  ;;  %s2148_s13 = smov (%p116_p0), 96   ;;  %vm2150_vm3 = vmmov (%p116_p0), 0   ;;  %s2151_s12 = smov (%p116_p0), 32   ;;  %vm764_vm4 = vcmask (%p116_p0), 523264  }
 0x14b   : > { %1808 = vmatprep.subr.mxu0 %v2146_v36  ;;  %1837 = vmatprep.subr.mxu1 %v2146_v36  ;;  %vm850_vm5 = vcmask (%p116_p0), 72704   ;;  %s2555_s0 = smov (%p116_p0), 0  }
 0x14c   : > { %1809 = vmatpush3.msra.mxu0 %v126_v41  ;;  %1839 = vmatprep.mubr.msk.f32.mxu1 %vm2147_vm1, %v2146_v36 }
 0x14d   : > { %1810 = vmatprep.subr.mxu0 %v2146_v36 }
 0x14e   : > { %1811 = vmatpush3.msra.mxu0 %v125_v43 }
 0x14f   : > { %1813 = vmatmul.mubr.msk.f32.vlgmr.msra.gmra.mxu0 %vm85_vm0, %v2369_v32  ;;  %1826 = vmatprep.subr.mxu0 %v2146_v36 }
 0x150   : > { %1834 = vmatprep.mubr.msk.f32.mxu0 %vm2147_vm1, %v2146_v36  ;;  %1827 = vmatpush3.msra.mxu0 %v298_v57 }
 0x151   : > { %1828 = vmatprep.subr.mxu0 %v2146_v36 }
 0x152   : > { %1829 = vmatpush3.msra.mxu0 %v297_v58 }
 0x153   : > { %1830 = vmatprep.subr.mxu0 %v2146_v36 }
 0x154   : > { %1831 = vmatpush3.msra.mxu0 %v296_v59 }
 0x155   : > { %1832 = vmatprep.subr.mxu0 %v2146_v36 }
 0x156   : > { %1833 = vmatpush3.msra.mxu0 %v295_v60  ;;  %v2149_v60 = vmov (%p116_p0), 0.0  }
 0x157   : > { %1835 = vmatmul.mubr.msk.f32.vlgmr.msra.gmra.mxu0 %vm85_vm0, %v2369_v32  ;;  %1847 = vmatprep.subr.mxu0 %v2146_v36 }
 0x158   : > { %1849 = vmatprep.mubr.msk.f32.mxu0 %vm2147_vm1, %v2146_v36 }
 0x20a   : > { %v290_v48 = vpop.f32.mrf.mxu1 }
 0x20b   : > { %v291_v50 = vadd.f32 %v1700_v46, %v290_v48  ;;  %v1707_v46 = vld [vmem:[%s483_s30] ss:$0 sm:$0xff] }
 0x20c   : > { %v1825_v52 = vpop.f32.mrf.mxu1 }
 0x20d   : > { %1838 = vmatpush3.xpose.msk.msra.mxu1 %vm377_vm2, %v291_v50 }
 0x20e   : > { %1842 = vmatprep.subr.mxu1 %v2146_v36 }
 0x20f   : > { %v206_v47 = vpop.f32.mrf.mxu0 }
 0x210   : > { %v207_v49 = vadd.f32 %v1698_v45, %v206_v47  ;;  %v567_v45 = vld [vmem:[%s566_s28] sm:$0xff] }
 0x211   : > { %v1814_v51 = vpop.f32.mrf.mxu0  ;;  %1848 = vmatpush3.msra.mxu0 %v567_v45 }
 0x212   : > { %v210_v54 = vmul.f32 0.35355338, %v207_v49  ;;  %1852 = vmatprep.subr.mxu0 (%p116_p0), %v2149_v60 }
 0x214   : > { %v462_v55 = vmul.f32 %v1706_v53, %v210_v54  ;;  %1840 = vmatmul.mubr.msk.f32.vlgmr.msra.gmra.mxu1 %vm377_vm2, %v210_v54 }
 0x215   : > { %1844 = vmatprep.mubr.msk.f32.mxu1 %vm2147_vm1, %v2146_v36 }
 0x216   : > { %v463_v56 = vsel %vm377_vm2, %v462_v55, 0.0 }
 0x217   : > { %464 = vadd.xlane.f32.xlu0 %v463_v56  ;;  %v373_v26 = vpop.f32.mrf.mxu0 }
 0x218   : > { %v374_v29 = vadd.f32 %v1702_v27, %v373_v26 }
 0x219   : > { %v1836_v31 = vpop.f32.mrf.mxu0 }
 0x21a   : > { %1843 = vmatpush3.msra.mxu1 %v374_v29 }
 0x21b   :  { %1863 = vmatprep.subr.mxu1 (%p116_p0), %v2149_v60 }
 0x2a0   : > { %v465_v1 = vpop.xlane.xlu0 %464 }
 0x2d4   : > { %v450_v61 = vpop.f32.mrf.mxu1 }
 0x2d5   : > { %v466_v62 = vsel %vm377_vm2, %v450_v61, -inf }
 0x2d6   : > { %467 = vmax.xlane.f32.xlu0 %v466_v62  ;;  %v1841_v63 = vpop.f32.mrf.mxu1 }
 0x35f   : > { %v468_v2 = vpop.xlane.xlu0 %467 }
 0x360   : > { %v469_v3 = vmax.f32 %v468_v2, %v465_v1 }
 0x362   : > { %v470_v4 = vsub.f32 %v450_v61, %v469_v3  ;;  %v473_v5 = vsub.f32 %v465_v1, %v469_v3 }
 0x364   : > { %v471_v6 = vmul.f32 1.442695, %v470_v4  ;;  %v474_v36 = vmul.f32 1.442695, %v473_v5 }
 0x366   : > { %2038 = vpow2.f32 %v471_v6 }
 0x367   : > { %2040 = vpow2.f32 %v474_v36 }
 0x373   : > { %v2039_v24 = vpop.eup %2038 }
 0x374   : > { %v476_v25 = vsel %vm377_vm2, %v2039_v24, 0.0  ;;  %v2041_v37 = vpop.eup %2040 }
 0x375   : > { %477 = vadd.xlane.f32.xlu1 %v476_v25 }
 0x386   :  { %854 = vrot.lane.b32.xlu1 (%p116_p0), %v2266_v0, %s2148_s13 }
 0x3fe   : > { %v478_v38 = vpop.xlane.xlu1 %477 }
 0x3ff   : > { %v479_v39 = vadd.f32 %v2041_v37, %v478_v38 }
 0x401   : > { %2042 = vrcp.f32 %v479_v39 }
 0x402   :  { %v855_v54 = vpop.permute.xlu1 (%p116_p0), %854 }
 0x403   :  { %v857_v55 = vsel (%p116_p0), %vm85_vm0, %v855_v54, 0.0 }
 0x404   :  { %858 = vadd.xlane.f32.xlu1 (%p116_p0), %v857_v55 }
 0x40e   : > { %v2043_v40 = vpop.eup %2042 }
 0x40f   : > { %v481_v41 = vmul.f32 %v2043_v40, %v2039_v24  ;;  %v482_v42 = vmul.f32 %v2043_v40, %v2041_v37 }
 0x411   : > { %1845 = vmatmul.mubr.msk.f32.vlgmr.msra.gmra.mxu1 %vm377_vm2, %v481_v41  ;;  %v2462_v34 = vadd.f32 %v2120_v34, %v481_v41   ;;  %v2465_v33 = vadd.f32 %v2116_v33, %v482_v42   ;;  %v491_v47 = vmul.f32 %v1707_v46, %v482_v42 }
 0x412   :  { %1864 = vmatpush3.msra.mxu1 (%p116_p0), %v2345_v21  ;;  %1879 = vmatprep.mubr.msk.f32.mxu1 (%p116_p0), %vm2150_vm3, %v2149_v60 }
 0x413   : > { %v2755_v43 = vmov %v2462_v34  ;;  %v2756_v44 = vmov %v2465_v33  ;;  %1865 = vmatprep.subr.mxu1 (%p116_p0), %v2149_v60 }
 0x414   :  { %1866 = vmatpush3.msra.mxu1 (%p116_p0), %v2340_v20 }
 0x415   :  { %1867 = vmatprep.subr.mxu1 (%p116_p0), %v2149_v60  ;;  %874 = vrot.lane.b32.xlu1 (%p116_p0), %v2360_v28, %s2151_s12 }
 0x416   :  { %1868 = vmatpush3.msra.mxu1 (%p116_p0), %v2335_v19 }
 0x417   :  { %1869 = vmatprep.subr.mxu1 (%p116_p0), %v2149_v60 }
 0x418   :  { %1870 = vmatpush3.msra.mxu1 (%p116_p0), %v2330_v18 }
 0x419   :  { %1871 = vmatprep.subr.mxu1 (%p116_p0), %v2149_v60  ;;  %878 = vrot.lane.b32.xlu1 (%p116_p0), %v2365_v30, %s2151_s12 }
 0x41a   :  { %1872 = vmatpush3.msra.mxu1 (%p116_p0), %v2325_v17 }
 0x41b   :  { %1873 = vmatprep.subr.mxu1 (%p116_p0), %v2149_v60 }
 0x41c   :  { %1874 = vmatpush3.msra.mxu1 (%p116_p0), %v2320_v16 }
 0x41d   :  { %1875 = vmatprep.subr.mxu1 (%p116_p0), %v2149_v60 }
 0x41e   :  { %1876 = vmatpush3.msra.mxu1 (%p116_p0), %v2315_v15 }
 0x41f   :  { %1877 = vmatprep.subr.mxu1 (%p116_p0), %v2149_v60 }
 0x420   :  { %1878 = vmatpush3.msra.mxu1 (%p116_p0), %v2310_v14 }
 0x48d   :  { %v859_v61 = vpop.xlane.xlu1 (%p116_p0), %858 }
 0x48e   :  { %v860_v62 = vmul.f32 (%p116_p0), 0.03125, %v859_v61 }
 0x490   :  { %v861_v63 = vsub.f32 (%p116_p0), %v2266_v0, %v860_v62 }
 0x491   :  { %v875_v45 = vpop.permute.xlu1 (%p116_p0), %874 }
 0x492   :  { %v862_v1 = vmul.f32 (%p116_p0), %v861_v63, %v861_v63 }
 0x4d1   : > { %v561_v48 = vpop.f32.mrf.mxu1 }
 0x4d2   : > { %v562_v49 = vadd.f32 %v561_v48, %v491_v47  ;;  %v879_v48 = vpop.permute.xlu1 (%p116_p0), %878 }
 0x4d3   : > { %v1846_v50 = vpop.f32.mrf.mxu1 }
 0x4d4   : > { %1850 = vmatmul.mubr.msk.f32.vlgmr.msra.gmra.mxu0 %vm377_vm2, %v562_v49 }
 0x4d5   :  { %1860 = vmatprep.mubr.msk.f32.mxu0 (%p116_p0), %vm2150_vm3, %v2149_v60  ;;  %1853 = vmatpush3.msra.mxu0 (%p116_p0), %v2300_v12 }
 0x4d6   :  { %1854 = vmatprep.subr.mxu0 (%p116_p0), %v2149_v60 }
 0x4d7   :  { %1855 = vmatpush3.msra.mxu0 (%p116_p0), %v2295_v11 }
 0x4d8   :  { %1856 = vmatprep.subr.mxu0 (%p116_p0), %v2149_v60 }
 0x4d9   :  { %1857 = vmatpush3.msra.mxu0 (%p116_p0), %v2290_v10 }
 0x4da   :  { %1858 = vmatprep.subr.mxu0 (%p116_p0), %v2149_v60 }
 0x4db   :  { %1859 = vmatpush3.msra.mxu0 (%p116_p0), %v2285_v9 }
 0x593   :  { %118 = sbr.rel (!%p116_p0) target bundleno = 320 (0x140), region = 137 }
 0x594   : > { %v637_v34 = vpop.f32.mrf.mxu0 }
 0x595   : > { %v641_v51 = vadd.f32 %v2124_v35, %v637_v34   ;;  %v2758_v34 = vmov %v2755_v43 }
 0x596   : > { %v1851_v33 = vpop.f32.mrf.mxu0  ;;  %v846_v34 = vmul.f32 (%p116_p0), 0.25, %v2755_v43  ;;  %v2553_v43 = vmov (%p116_p0), 0.0  }
 0x597   : > { %v2757_v33 = vmov %v2756_v44  ;;  %v2759_v35 = vmov %v641_v51  ;;  %v644_v52 = vadd.f32 (%p116_p0), %v641_v51, %v2266_v0  ;;  %v847_v51 = vmul.f32 (%p116_p0), 0.25, %v2756_v44 }
 0x599   :  { %v2492_v35 = vadd.f32 %v2355_v23, %v644_v52  ;;  %v849_v33 = vsel %vm377_vm2, %v846_v34, %v847_v51 }
 0x59a   :  { %v851_v52 = vsel %vm850_vm5, %v849_v33, 0.0 }
 0x59b   :  { %v652_v53 = vsel %vm85_vm0, %v2492_v35, 0.0  ;;  %852 = vst [vmem:[#allocation2] sm:$0xff] %v851_v52 }
 0x59c   :  { %653 = vadd.xlane.f32.xlu0 %v652_v53 }
 0x625   :  { %v654_v56 = vpop.xlane.xlu0 %653 }
 0x626   :  { %v655_v57 = vmul.f32 0.03125, %v654_v56 }
 0x628   :  { %v656_v32 = vsub.f32 %v2492_v35, %v655_v57  ;;  %v2549_v57 = vmov 0.0  }
 0x62a   :  { %v657_v58 = vmul.f32 %v656_v32, %v656_v32 }
 0x62c   :  { %v658_v59 = vsel %vm85_vm0, %v657_v58, 0.0 }
 0x62d   :  { %659 = vadd.xlane.f32.xlu0 %v658_v59 }
 0x643   :  { %864 = vrot.lane.b32.xlu0 %v862_v1, %s2148_s13 }
 0x6b6   :  { %v660_v2 = vpop.xlane.xlu0 %659 }
 0x6b7   :  { %v661_v3 = vmul.f32 0.03125, %v660_v2 }
 0x6b9   :  { %v662_v4 = vadd.f32 1e-05, %v661_v3 }
 0x6ba   :  { %v865_v25 = vpop.permute.xlu0 %864 }
 0x6bb   :  { %2044 = vrsqrt.f32 %v662_v4  ;;  %v867_v30 = vsel %vm85_vm0, %v865_v25, 0.0 }
 0x6bc   :  { %868 = vadd.xlane.f32.xlu0 %v867_v30 }
 0x6c8   :  { %v2045_v5 = vpop.eup %2044 }
 0x6c9   :  { %v664_v6 = vmul.f32 %v2045_v5, %v656_v32  ;;  %v2551_v32 = vmov 0.0  }
 0x6cb   :  { %v671_v24 = vmul.f32 %v2275_v7, %v664_v6 }
 0x6cd   :  { %v678_v28 = vadd.f32 %v2280_v8, %v671_v24 }
 0x6cf   :  { %1861 = vmatmul.mubr.msk.f32.vlgmr.msra.gmra.mxu0 %vm85_vm0, %v678_v28 }
 0x745   :  { %v869_v36 = vpop.xlane.xlu0 %868 }
 0x746   :  { %v870_v37 = vmul.f32 0.03125, %v869_v36 }
 0x748   :  { %v871_v38 = vadd.f32 1e-05, %v870_v37 }
 0x78f   :  { %v754_v26 = vpop.f32.mrf.mxu0 }
 0x790   :  { %v755_v27 = vadd.f32 %v2305_v13, %v754_v26 }
 0x791   :  { %v1862_v29 = vpop.f32.mrf.mxu0 }
 0x792   :  { %v760_v31 = vmul.f32 0.70710677, %v755_v27  ;;  %v758_v40 = vmul.f32 0.5, %v755_v27 }
 0x794   :  { %2046 = verf.f32 %v760_v31 }
 0x795   :  { %2048 = vrsqrt.f32 %v871_v38 }
 0x7a1   :  { %v2047_v39 = vpop.eup %2046 }
 0x7a2   :  { %v762_v41 = vadd.f32 1.0, %v2047_v39  ;;  %v2049_v46 = vpop.eup %2048 }
 0x7a3   :  { %v873_v47 = vmul.f32 %v2049_v46, %v861_v63 }
 0x7a4   :  { %v763_v42 = vmul.f32 %v762_v41, %v758_v40 }
 0x7a5   :  { %v877_v49 = vmul.f32 %v875_v45, %v873_v47 }
 0x7a6   :  { %1880 = vmatmul.mubr.msk.f32.vlgmr.msra.gmra.mxu1 %vm764_vm4, %v763_v42 }
 0x7a7   :  { %v2539_v50 = vadd.f32 %v879_v48, %v877_v49 }
 0x866   :  { %v834_v53 = vpop.f32.mrf.mxu1 }
 0x867   :  { %v838_v54 = vadd.f32 %v834_v53, %v2492_v35 }
 0x868   :  { %v1881_v55 = vpop.f32.mrf.mxu1 }
 0x869   :  { %v2547_v56 = vadd.f32 %v2350_v22, %v838_v54 }
 0x86a LB: > { %s2152_s14 = smov 96   ;;  %v2153_v44 = vmov 0.0   ;;  %s2572_s21 = sshll.u32 %s2144_s0, 5  ;;  %vm2154_vm6 = vmmov 0   ;;  %s2144_s0 = sphi %s2555_s0, %s887_s0   ;;  %v2140_v43 = vphi %v2553_v43, %v2766_v43   ;;  %v2136_v32 = vphi %v2551_v32, %v2765_v32   ;;  %v2132_v57 = vphi %v2549_v57, %v2764_v57  }
 0x86b   : > { %906 = vrot.lane.b32.xlu0 %v2539_v50, %s2152_s14  ;;  %1882 = vmatprep.subr.mxu0 %v2153_v44  ;;  %s2760_s23 = sld [smem:[#allocation8_spill]]  ;;  %s981_s18 = scalar_lea.vmem %s2729_s5, %s2572_s21 }
 0x86c   : > { %1893 = vmatprep.subr.mxu1 %v2153_v44  ;;  %1890 = vmatprep.mubr.msk.f32.mxu0 %vm2154_vm6, %v2153_v44  ;;  %v985_v58 = vld [vmem:[%s981_s18 + $0x18] sm:$0xff]  ;;  %v984_v61 = vld [vmem:[%s981_s18 + $0x10] sm:$0xff]  ;;  %v983_v63 = vld [vmem:[%s981_s18 + $0x8] sm:$0xff]  ;;  %s1064_s3 = scalar_lea.vmem %s2731_s7, %s2572_s21  ;;  %s2761_s27 = sld [smem:[#allocation9_spill]] }
 0x86d   : > { %1901 = vmatprep.mubr.msk.f32.mxu1 %vm2154_vm6, %v2153_v44  ;;  %1894 = vmatpush3.msra.mxu1 %v985_v58  ;;  %v982_v2 = vld [vmem:[%s981_s18] sm:$0xff]  ;;  %v1068_v3 = vld [vmem:[%s1064_s3 + $0x18] sm:$0xff]  ;;  %v1067_v5 = vld [vmem:[%s1064_s3 + $0x10] sm:$0xff]  ;;  %s986_s30 = scalar_lea.vmem %s2730_s6, %s2144_s0  ;;  %s1223_s1 = scalar_lea.vmem %s2733_s9, %s2144_s0 }
 0x86e   : > { %1895 = vmatprep.subr.mxu1 %v2153_v44  ;;  %v1066_v6 = vld [vmem:[%s1064_s3 + $0x8] sm:$0xff]  ;;  %v1065_v24 = vld [vmem:[%s1064_s3] sm:$0xff]  ;;  %s1730_s17 = sshll.u32 %s2144_s0, 3  ;;  %s1252_s16 = scalar_lea.vmem %s2734_s10, %s2144_s0 }
 0x86f   : > { %1896 = vmatpush3.msra.mxu1 %v984_v61  ;;  %v1721_v25 = vld [vmem:[%s986_s30] ss:$0 sm:$0xff]  ;;  %s1335_s25 = scalar_lea.vmem %s2735_s11, %s1730_s17 }
 0x870   : > { %1897 = vmatprep.subr.mxu1 %v2153_v44  ;;  %v1727_v37 = vld [vmem:[%s1223_s1] ss:$0 sm:$0xff] }
 0x871   : > { %s892_s24 = scalar_lea.vmem %s2760_s23, %s2572_s21  ;;  %1898 = vmatpush3.msra.mxu1 %v983_v63 }
 0x872   : > { %v896_v35 = vld [vmem:[%s892_s24 + $0x18] sm:$0xff]  ;;  %v895_v59 = vld [vmem:[%s892_s24 + $0x10] sm:$0xff]  ;;  %v894_v62 = vld [vmem:[%s892_s24 + $0x8] sm:$0xff]  ;;  %1899 = vmatprep.subr.mxu1 %v2153_v44  ;;  %s897_s28 = scalar_lea.vmem %s2761_s27, %s2144_s0 }
 0x873   : > { %1883 = vmatpush3.msra.mxu0 %v896_v35  ;;  %v893_v1 = vld [vmem:[%s892_s24] sm:$0xff]  ;;  %1900 = vmatpush3.msra.mxu1 %v982_v2  ;;  %s1069_s24 = scalar_lea.vmem %s2732_s8, %s2144_s0  ;;  %s887_s0 = sadd.s32 1, %s2144_s0  }
 0x874   : > { %1884 = vmatprep.subr.mxu0 %v2153_v44  ;;  %1915 = vmatprep.subr.mxu1 %v2153_v44  ;;  %v1719_v28 = vld [vmem:[%s897_s28] ss:$0 sm:$0xff]  ;;  %p884_p1 = scmp.ge.s32.totalorder %s887_s0, 4  }
 0x875   : > { %1885 = vmatpush3.msra.mxu0 %v895_v59  ;;  %v1723_v40 = vld [vmem:[%s1069_s24] ss:$0 sm:$0xff]  ;;  %s2155_s5 = smov (%p884_p1), [#allocation2]  }
 0x876   : > { %1886 = vmatprep.subr.mxu0 %v2153_v44  ;;  %s1628_s6 = sshll.u32 (%p884_p1), %s2155_s5, 4  ;;  %s1629_s6 = int_to_ptr.vmem [resolvable:$true] %s1628_s6 }
 0x877   : > { %1887 = vmatpush3.msra.mxu0 %v894_v62  ;;  %s2060_s7 = scalar_lea.vmem (%p884_p1), %s1629_s6, 256  ;;  %p2065_p3 = scmp.lt.s32.totalorder (%p884_p1), %s1629_s6, %s1629_s6 }
 0x878   : > { %1888 = vmatprep.subr.mxu0 %v2153_v44  ;;  %p2061_p2 = scmp.ne.s32.totalorder (%p884_p1), %s1629_s6, %s2060_s7  ;;  %p2066_p4 = scmp.lt.s32.totalorder (%p884_p1), %s2060_s7, %s2060_s7 }
 0x879   : > { %1889 = vmatpush3.msra.mxu0 %v893_v1 }
 0x87a   : > { %1904 = vmatprep.subr.mxu0 %v2153_v44  ;;  %p2067_p5 = por (%p884_p1), %p2066_p4, %p2065_p3 }
 0x87c   :  { %p2068_p6 = pnand (%p884_p1), %p2067_p5, %p2061_p2 }
 0x8dd   : > { %v907_v4 = vpop.permute.xlu0 %906 }
 0x8de   : > { %1891 = vmatmul.mubr.msk.f32.vlgmr.msra.gmra.mxu0 %vm85_vm0, %v907_v4  ;;  %1902 = vmatmul.mubr.msk.f32.vlgmr.msra.gmra.mxu1 %vm85_vm0, %v907_v4 }
 0x8df   : > { %1905 = vmatpush3.msra.mxu0 %v1068_v3  ;;  %1912 = vmatprep.mubr.msk.f32.mxu0 %vm2154_vm6, %v2153_v44 }
 0x8e0   : > { %1906 = vmatprep.subr.mxu0 %v2153_v44  ;;  %1917 = vmatprep.mubr.msk.f32.mxu1 %vm2154_vm6, %v2153_v44 }
 0x8e1   : > { %1907 = vmatpush3.msra.mxu0 %v1067_v5  ;;  %v1728_v5 = vld [vmem:[%s1252_s16] ss:$0 sm:$0xff] }
 0x8e2   : > { %1908 = vmatprep.subr.mxu0 %v2153_v44 }
 0x8e3   : > { %1909 = vmatpush3.msra.mxu0 %v1066_v6 }
 0x8e4   : > { %1910 = vmatprep.subr.mxu0 %v2153_v44 }
 0x8e5   : > { %1911 = vmatpush3.msra.mxu0 %v1065_v24 }
 0x8e6   : > { %1913 = vmatmul.mubr.msk.f32.vlgmr.msra.gmra.mxu0 %vm85_vm0, %v907_v4  ;;  %1925 = vmatprep.subr.mxu0 %v2153_v44  ;;  %v1336_v4 = vld [vmem:[%s1335_s25] sm:$0xff] }
 0x8e7   : > { %1927 = vmatprep.mubr.msk.f32.mxu0 %vm2154_vm6, %v2153_v44  ;;  %1926 = vmatpush3.msra.mxu0 %v1336_v4 }
 0x8e8   :  { %1930 = vmatprep.subr.mxu0 (%p884_p1), %v2149_v60 }
 0x99e   : > { %v976_v30 = vpop.f32.mrf.mxu0  ;;  %v1060_v26 = vpop.f32.mrf.mxu1 }
 0x99f   : > { %v977_v27 = vadd.f32 %v1719_v28, %v976_v30  ;;  %v1061_v29 = vadd.f32 %v1721_v25, %v1060_v26 }
 0x9a0   : > { %v1892_v31 = vpop.f32.mrf.mxu0  ;;  %v1903_v36 = vpop.f32.mrf.mxu1 }
 0x9a1   : > { %v980_v38 = vmul.f32 0.35355338, %v977_v27  ;;  %1916 = vmatpush3.xpose.msk.msra.mxu1 %vm377_vm2, %v1061_v29 }
 0x9a2   : > { %1920 = vmatprep.subr.mxu1 %v2153_v44 }
 0x9a3   : > { %v1231_v39 = vmul.f32 %v1727_v37, %v980_v38 }
 0x9a4   : > { %1918 = vmatmul.mubr.msk.f32.vlgmr.msra.gmra.mxu1 %vm377_vm2, %v980_v38 }
 0x9a5   : > { %v1232_v41 = vsel %vm377_vm2, %v1231_v39, 0.0  ;;  %1922 = vmatprep.mubr.msk.f32.mxu1 %vm2154_vm6, %v2153_v44 }
 0x9a6   : > { %v1143_v42 = vpop.f32.mrf.mxu0  ;;  %1233 = vadd.xlane.f32.xlu0 %v1232_v41 }
 0x9a7   : > { %v1144_v45 = vadd.f32 %v1723_v40, %v1143_v42 }
 0x9a8   : > { %v1914_v46 = vpop.f32.mrf.mxu0 }
 0x9a9   : > { %1921 = vmatpush3.msra.mxu1 %v1144_v45 }
 0x9aa   :  { %1941 = vmatprep.subr.mxu1 (%p884_p1), %v2149_v60 }
 0xa2f   : > { %v1234_v34 = vpop.xlane.xlu0 %1233 }
 0xa64   : > { %v1219_v47 = vpop.f32.mrf.mxu1 }
 0xa65   : > { %v1235_v48 = vsel %vm377_vm2, %v1219_v47, -inf }
 0xa66   : > { %1236 = vmax.xlane.f32.xlu1 %v1235_v48  ;;  %v1919_v49 = vpop.f32.mrf.mxu1 }
 0xaef   : > { %v1237_v51 = vpop.xlane.xlu1 %1236 }
 0xaf0   : > { %v1238_v33 = vmax.f32 %v1237_v51, %v1234_v34 }
 0xaf2   : > { %v1239_v52 = vsub.f32 %v1219_v47, %v1238_v33  ;;  %v1242_v53 = vsub.f32 %v1234_v34, %v1238_v33 }
 0xaf4   : > { %v1240_v54 = vmul.f32 1.442695, %v1239_v52  ;;  %v1243_v35 = vmul.f32 1.442695, %v1242_v53 }
 0xaf6   : > { %2050 = vpow2.f32 %v1240_v54 }
 0xaf7   : > { %2052 = vpow2.f32 %v1243_v35 }
 0xb03   : > { %v2051_v55 = vpop.eup %2050 }
 0xb04   : > { %v1245_v44 = vsel %vm377_vm2, %v2051_v55, 0.0  ;;  %v2053_v58 = vpop.eup %2052 }
 0xb05   : > { %1246 = vadd.xlane.f32.xlu1 %v1245_v44 }
 0xb8e   : > { %v1247_v59 = vpop.xlane.xlu1 %1246 }
 0xb8f   : > { %v1248_v61 = vadd.f32 %v2053_v58, %v1247_v59 }
 0xb91   : > { %2054 = vrcp.f32 %v1248_v61 }
 0xb9e   : > { %v2055_v62 = vpop.eup %2054 }
 0xb9f   : > { %v1250_v63 = vmul.f32 %v2055_v62, %v2051_v55  ;;  %v1251_v1 = vmul.f32 %v2055_v62, %v2053_v58 }
 0xba1   : > { %1923 = vmatmul.mubr.msk.f32.vlgmr.msra.gmra.mxu1 %vm377_vm2, %v1250_v63  ;;  %v2638_v32 = vadd.f32 %v2136_v32, %v1250_v63   ;;  %v2641_v57 = vadd.f32 %v2132_v57, %v1251_v1   ;;  %v1260_v6 = vmul.f32 %v1728_v5, %v1251_v1 }
 0xba2   :  { %1942 = vmatpush3.msra.mxu1 (%p884_p1), %v2345_v21  ;;  %1957 = vmatprep.mubr.msk.f32.mxu1 (%p884_p1), %vm2150_vm3, %v2149_v60 }
 0xba3   : > { %v2762_v2 = vmov %v2638_v32  ;;  %v2763_v3 = vmov %v2641_v57  ;;  %1943 = vmatprep.subr.mxu1 (%p884_p1), %v2149_v60 }
 0xba4   :  { %1944 = vmatpush3.msra.mxu1 (%p884_p1), %v2340_v20  ;;  %v1613_v42 = vmul.f32 (%p884_p1), 0.25, %v2762_v2  ;;  %v1614_v45 = vmul.f32 (%p884_p1), 0.25, %v2763_v3 }
 0xba5   :  { %1945 = vmatprep.subr.mxu1 (%p884_p1), %v2149_v60 }
 0xba6   :  { %1946 = vmatpush3.msra.mxu1 (%p884_p1), %v2335_v19  ;;  %v1615_v46 = vsel (%p884_p1), %vm377_vm2, %v1613_v42, %v1614_v45 }
 0xba7   :  { %1947 = vmatprep.subr.mxu1 (%p884_p1), %v2149_v60  ;;  %v1616_v47 = vsel (%p884_p1), %vm850_vm5, %v1615_v46, 0.0 }
 0xba8   :  { %1948 = vmatpush3.msra.mxu1 (%p884_p1), %v2330_v18  ;;  %1618 = vst [vmem:[#allocation2 + $0x8] sm:$0xff] (%p884_p1), %v1616_v47 }
 0xba9   :  { %1949 = vmatprep.subr.mxu1 (%p884_p1), %v2149_v60 }
 0xbaa   :  { %1950 = vmatpush3.msra.mxu1 (%p884_p1), %v2325_v17 }
 0xbab   :  { %1951 = vmatprep.subr.mxu1 (%p884_p1), %v2149_v60 }
 0xbac   :  { %1952 = vmatpush3.msra.mxu1 (%p884_p1), %v2320_v16 }
 0xbad   :  { %1953 = vmatprep.subr.mxu1 (%p884_p1), %v2149_v60 }
 0xbae   :  { %1954 = vmatpush3.msra.mxu1 (%p884_p1), %v2315_v15 }
 0xbaf   :  { %1955 = vmatprep.subr.mxu1 (%p884_p1), %v2149_v60 }
 0xbb0   :  { %1956 = vmatpush3.msra.mxu1 (%p884_p1), %v2310_v14 }
 0xc61   : > { %v1330_v24 = vpop.f32.mrf.mxu1 }
 0xc62   : > { %v1331_v28 = vadd.f32 %v1330_v24, %v1260_v6 }
 0xc63   : > { %v1924_v25 = vpop.f32.mrf.mxu1 }
 0xc64   : > { %1928 = vmatmul.mubr.msk.f32.vlgmr.msra.gmra.mxu0 %vm377_vm2, %v1331_v28 }
 0xc65   :  { %1931 = vmatpush3.msra.mxu0 (%p884_p1), %v2300_v12  ;;  %1938 = vmatprep.mubr.msk.f32.mxu0 (%p884_p1), %vm2150_vm3, %v2149_v60 }
 0xc66   :  { %1932 = vmatprep.subr.mxu0 (%p884_p1), %v2149_v60 }
 0xc67   :  { %1933 = vmatpush3.msra.mxu0 (%p884_p1), %v2295_v11 }
 0xc68   :  { %1934 = vmatprep.subr.mxu0 (%p884_p1), %v2149_v60 }
 0xc69   :  { %1935 = vmatpush3.msra.mxu0 (%p884_p1), %v2290_v10 }
 0xc6a   :  { %1936 = vmatprep.subr.mxu0 (%p884_p1), %v2149_v60 }
 0xc6b   :  { %1937 = vmatpush3.msra.mxu0 (%p884_p1), %v2285_v9 }
 0xd23   :  { %886 = sbr.rel (!%p884_p1) target bundleno = 2154 (0x86a), region = 148 }
 0xd24   : > { %v1406_v32 = vpop.f32.mrf.mxu0 }
 0xd25   : > { %v1410_v30 = vadd.f32 %v2140_v43, %v1406_v32   ;;  %v2765_v32 = vmov %v2762_v2 }
 0xd26   : > { %v1929_v57 = vpop.f32.mrf.mxu0 }
 0xd27   : > { %v2764_v57 = vmov %v2763_v3  ;;  %v2766_v43 = vmov %v1410_v30  ;;  %1414 = vrot.lane.b32.xlu0 (%p884_p1), %v1410_v30, %s2151_s12 }
 0xd2b   :  { %1418 = vrot.lane.b32.xlu0 %v2355_v23, %s2151_s12 }
 0xd99   :  { %v1415_v9 = vpop.permute.xlu0 %1414 }
 0xd9a   :  { %v1417_v10 = vadd.f32 %v1415_v9, %v2266_v0 }
 0xd9d   :  { %v1419_v11 = vpop.permute.xlu0 %1418 }
 0xd9e   :  { %v1421_v12 = vadd.f32 %v1419_v11, %v1417_v10 }
 0xda0   :  { %1423 = vrot.lane.b32.xlu1 %v1421_v12, %s2148_s13 }
 0xe12   :  { %v1424_v17 = vpop.permute.xlu1 %1423 }
 0xe13   :  { %v1426_v18 = vsel %vm85_vm0, %v1424_v17, 0.0 }
 0xe14   :  { %1427 = vadd.xlane.f32.xlu1 %v1426_v18 }
 0xe25   :  { %1443 = vrot.lane.b32.xlu1 %v2275_v7, %s2151_s12 }
 0xe9d   :  { %v1428_v16 = vpop.xlane.xlu1 %1427 }
 0xe9e   :  { %v1429_v15 = vmul.f32 0.03125, %v1428_v16 }
 0xea0   :  { %v1430_v19 = vsub.f32 %v1421_v12, %v1429_v15 }
 0xea1   :  { %v1444_v50 = vpop.permute.xlu1 %1443 }
 0xea2   :  { %v1431_v20 = vmul.f32 %v1430_v19, %v1430_v19 }
 0xea4   :  { %1433 = vrot.lane.b32.xlu0 %v1431_v20, %s2148_s13 }
 0xf16   :  { %v1434_v14 = vpop.permute.xlu0 %1433 }
 0xf17   :  { %v1436_v0 = vsel %vm85_vm0, %v1434_v14, 0.0 }
 0xf18   :  { %1437 = vadd.xlane.f32.xlu0 %v1436_v0 }
 0xf2e   :  { %1447 = vrot.lane.b32.xlu0 %v2280_v8, %s2151_s12 }
 0xf32   :  { %1609 = vrot.lane.b32.xlu0 %v2350_v22, %s2151_s12 }
 0xfa1   :  { %v1438_v21 = vpop.xlane.xlu0 %1437 }
 0xfa2   :  { %v1439_v23 = vmul.f32 0.03125, %v1438_v21 }
 0xfa4   :  { %v1440_v60 = vadd.f32 1e-05, %v1439_v23 }
 0xfa5   :  { %v1448_v26 = vpop.permute.xlu0 %1447 }
 0xfa6   :  { %2056 = vrsqrt.f32 %v1440_v60 }
 0xfb3   :  { %v2057_v7 = vpop.eup %2056 }
 0xfb4   :  { %v1442_v43 = vmul.f32 %v2057_v7, %v1430_v19 }
 0xfb6   :  { %v1446_v27 = vmul.f32 %v1444_v50, %v1442_v43 }
 0xfb8   :  { %v1450_v29 = vadd.f32 %v1448_v26, %v1446_v27 }
 0xfba   :  { %1452 = vrot.lane.b32.xlu1 %v1450_v29, %s2148_s13 }
0x102c   :  { %v1453_v31 = vpop.permute.xlu1 %1452 }
0x102d   :  { %1939 = vmatmul.mubr.msk.f32.vlgmr.msra.gmra.mxu0 %vm85_vm0, %v1453_v31 }
0x10ed   :  { %v1522_v36 = vpop.f32.mrf.mxu0 }
0x10ee   :  { %v1523_v8 = vadd.f32 %v2305_v13, %v1522_v36 }
0x10ef   :  { %v1940_v37 = vpop.f32.mrf.mxu0 }
0x10f0   :  { %v1527_v22 = vmul.f32 0.70710677, %v1523_v8  ;;  %v1526_v39 = vmul.f32 0.5, %v1523_v8 }
0x10f2   :  { %2058 = verf.f32 %v1527_v22 }
0x10ff   :  { %v2059_v38 = vpop.eup %2058 }
0x1100   :  { %v1529_v40 = vadd.f32 1.0, %v2059_v38 }
0x1102   :  { %v1530_v41 = vmul.f32 %v1529_v40, %v1526_v39 }
0x1104   :  { %1958 = vmatmul.mubr.msk.f32.vlgmr.msra.gmra.mxu1 %vm764_vm4, %v1530_v41 }
0x1105   :  { %2071 = shalt.err (!%p2068_p6)
}
0x1106   :  { %s2156_s8 = smov 128   ;;  %s2157_s9 = smov 8   ;;  %v1610_v34 = vpop.permute.xlu0 %1609 }
0x1107   :  { %1634 = dma.vmem_to_hbm [thread:$0]  %s1629_s6, 256, %s2744_s20, [#allocation3], %s2156_s8, %s2156_s8, %s2157_s9  }
0x11c4   :  { %v1600_v13 = vpop.f32.mrf.mxu1 }
0x11c5   :  { %1605 = vrot.lane.b32.xlu1 %v1600_v13, %s2151_s12 }
0x11c6   :  { %v1959_v48 = vpop.f32.mrf.mxu1 }
0x1237   :  { %v1606_v49 = vpop.permute.xlu1 %1605 }
0x1238   :  { %v1608_v51 = vadd.f32 %v1606_v49, %v1421_v12 }
0x123a   :  { %v1612_v33 = vadd.f32 %v1610_v34, %v1608_v51 }
0x123c   :  { %v1619_v52 = vsel %vm85_vm0, %v2547_v56, %v1612_v33 }
0x123d   :  { %1620 = vst.msk [vmem:[%s2743_s19] sm:$0xff] %vm764_vm4, %v1619_v52 }
0x123e   :  { %2112 = dma.done.wait [#allocation3], 256  }
0x123f   :  { %2113 = vsyncadd [#allocation3], 4294967040 }
0x1240   :  { %1640 = vsyncpa [#allocation3], 1 }

</bundles_post_ra>
